<compile_context>
chip_gen: v5e
topology: v5e:2x2
jax: 0.10.0
libtpu: 0.0.40
codegen_flags: <defaults>
</compile_context>

<pallas_src>
import functools
import math

import jax
import jax.numpy as jnp
from jax import lax
from jax.experimental import pallas as pl
from jax.experimental.pallas import tpu as pltpu
import numpy as np


# ---------------------------------------------------------------------------
# Fused kernel: scaled QK^T + softmax + channel-mean for BOTH branches
# ---------------------------------------------------------------------------
def _dac_fused_kernel(qps_ref, kps_ref, qpn_ref, kpn_ref, ops_ref, opn_ref,
                      acc_ps_ref, acc_pn_ref, *,
                      scale_ps, scale_pn, heads_per_block, e_ps, e_pn,
                      channel, unroll):
    """One grid step = one (batch, head-block) slab with all channels resident.

    Input refs  : (channel, L, heads_per_block * E)  -- natural q/k layout (no host
                  transpose); per-head slices are static lane slices.
    Output refs : (heads_per_block, L, L)            -- channel-mean attention maps.
    Scratch     : f32 accumulators matching the outputs.

    The channel axis is walked with a (possibly unrolled) fori_loop that accumulates
    softmax(scale * q_c @ k_c^T) / channel, so only per-channel intermediates are
    ever live instead of a (heads*channel, L, L) batched softmax.
    """
    acc_ps_ref[...] = jnp.zeros_like(acc_ps_ref)
    acc_pn_ref[...] = jnp.zeros_like(acc_pn_ref)
    inv_c = jnp.float32(1.0 / channel)

    def body(c, carry):
        def branch(q_ref, k_ref, scale, e, acc_ref):
            q_c = q_ref[c]                          # (L, heads_per_block * E)
            k_c = k_ref[c]
            for h in range(heads_per_block):        # static, small
                qh = q_c[:, h * e:(h + 1) * e]      # (L, E) static lane slice
                kh = k_c[:, h * e:(h + 1) * e]
                # contract on E; no explicit transpose
                s = lax.dot_general(qh, kh, (((1,), (1,)), ((), ())),
                                    preferred_element_type=jnp.float32)
                s = s * scale
                s = s - jnp.max(s, axis=-1, keepdims=True)   # stable softmax
                p = jnp.exp(s)
                p = p / jnp.sum(p, axis=-1, keepdims=True)   # exact divide (rows sum to 1)
                acc_ref[h] += p * inv_c                      # running channel mean
        branch(qps_ref, kps_ref, scale_ps, e_ps, acc_ps_ref)
        branch(qpn_ref, kpn_ref, scale_pn, e_pn, acc_pn_ref)
        return carry

    lax.fori_loop(0, channel, body, 0, unroll=unroll)

    ops_ref[...] = acc_ps_ref[...].astype(ops_ref.dtype)
    opn_ref[...] = acc_pn_ref[...].astype(opn_ref.dtype)


# ---------------------------------------------------------------------------
# VMEM budgeting (padding-aware, generation-gated)
# ---------------------------------------------------------------------------
def _round_up(x, m):
    return ((x + m - 1) // m) * m


def _vmem_budgets():
    """(block_budget_bytes, vmem_limit_bytes), gated on the chip's physical VMEM."""
    phys = 64 * 1024 * 1024                 # conservative default (v7x-class per-TC VMEM)
    try:
        info = pltpu.get_tpu_info()
        phys = int(getattr(info, "vmem_capacity_bytes", phys))
    except Exception:
        pass
    if phys <= 64 * 1024 * 1024:            # v7x: 64 MiB physical per TensorCore
        return 22 * 1024 * 1024, 48 * 1024 * 1024
    return 48 * 1024 * 1024, 96 * 1024 * 1024   # v5e / v6e: 128 MiB physical


def _padded_block_bytes(Ht, *, channel, L_ps, E_ps, L_pn, E_pn, in_itemsize, unroll):
    """VMEM bytes for one grid step at head-tile Ht, counting (8,128) tile padding."""
    def in_blk(L, E):        # one (channel, L, Ht*E) input block
        return channel * _round_up(L, 8) * _round_up(Ht * E, 128) * in_itemsize

    def map_blk(L):          # one (Ht, L, L) f32 attention-map tile
        return Ht * _round_up(L, 8) * _round_up(L, 128) * 4

    inputs = 2 * 2 * (in_blk(L_ps, E_ps) + in_blk(L_pn, E_pn))   # q+k, both branches, double-buffered
    outputs = 2 * (map_blk(L_ps) + map_blk(L_pn))                # double-buffered output blocks
    scratch = map_blk(L_ps) + map_blk(L_pn)                      # accumulators
    # live per-channel-iteration softmax temporaries (scores/probs + q/k head slices)
    temps = unroll * 4 * 4 * (
        _round_up(L_ps, 8) * (_round_up(L_ps, 128) + _round_up(E_ps, 128))
        + _round_up(L_pn, 8) * (_round_up(L_pn, 128) + _round_up(E_pn, 128)))
    return inputs + outputs + scratch + temps


def _pick_head_tile(H, E_ps, E_pn, bytes_fn, budget, prefer_multi_block):
    """Largest legal head tile that fits the padded-VMEM budget.

    Legality: the blocked last dim (Ht*E) must be a multiple of 128 or Ht == H.
    When prefer_multi_block (single-batch on a multi-TC chip), prefer a tile that
    yields >= 2 head blocks so both TensorCores get grid steps.
    """
    valid = [d for d in range(1, H + 1)
             if H % d == 0 and (d == H or ((d * E_ps) % 128 == 0 and (d * E_pn) % 128 == 0))]
    fitting = [d for d in valid if bytes_fn(d) <= budget]
    if not fitting:
        # TODO(synk): add a channel-blocking grid axis for extreme channel counts.
        return min(valid)
    if prefer_multi_block:
        multi = [d for d in fitting if H // d >= 2]
        if multi:
            return max(multi)
    return max(fitting)


# ---------------------------------------------------------------------------
# Expansion helpers (post-kernel, channel-mean already applied)
# ---------------------------------------------------------------------------
def _upsample_last2(x, p):
    """einops.repeat 'b h m n -> b h (m p) (n p)' via reshape/broadcast (no gather)."""
    if p == 1:
        return x
    b, h, l, _ = x.shape
    x = x[:, :, :, None, :, None]
    x = jnp.broadcast_to(x, (b, h, l, p, l, p))
    return x.reshape(b, h, l * p, l * p)


# ---------------------------------------------------------------------------
# Wrapper reproducing DAC_structure.forward (output_attention=True path)
# ---------------------------------------------------------------------------
def dac_structure_forward(queries_patch_size, queries_patch_num,
                          keys_patch_size, keys_patch_num,
                          values, patch_index, attn_mask=None, *,
                          win_size, patch_size, channel, scale=None,
                          compute_dtype=None):
    del values, attn_mask  # unused by the PyTorch forward

    B_tot, L_ps, H, E_ps = queries_patch_size.shape
    _, L_pn, _, E_pn = queries_patch_num.shape
    assert B_tot % channel == 0
    B = B_tot // channel

    # Matches PyTorch's `self.scale or 1/sqrt(E)` (a falsy 0.0 also falls back).
    scale_ps = float(scale) if scale else 1.0 / math.sqrt(E_ps)
    scale_pn = float(scale) if scale else 1.0 / math.sqrt(E_pn)

    def prep(x, L, E):
        # (B*channel, L, H, E) -> (B, channel, L, H*E): leading-dim split + trailing
        # dim merge of a contiguous array => free metadata reshape, no HBM relayout.
        x = x.reshape(B, channel, L, H * E)
        if compute_dtype is not None and x.dtype != compute_dtype:
            x = x.astype(compute_dtype)   # e.g. bf16 to halve the dominant q/k read traffic
        return x

    qps = prep(queries_patch_size, L_ps, E_ps)
    kps = prep(keys_patch_size, L_ps, E_ps)
    qpn = prep(queries_patch_num, L_pn, E_pn)
    kpn = prep(keys_patch_num, L_pn, E_pn)
    in_itemsize = qps.dtype.itemsize

    # Channel-loop unroll factor (chosen so it always divides the trip count).
    unroll = max(u for u in (8, 4, 2, 1) if channel % u == 0)

    block_budget, vmem_limit = _vmem_budgets()
    bytes_fn = functools.partial(
        _padded_block_bytes, channel=channel, L_ps=L_ps, E_ps=E_ps,
        L_pn=L_pn, E_pn=E_pn, in_itemsize=in_itemsize, unroll=unroll)
    Ht = _pick_head_tile(H, E_ps, E_pn, bytes_fn, block_budget,
                         prefer_multi_block=(B == 1 and H > 1))

    grid = (B, H // Ht)

    def in_spec(L, E):
        return pl.BlockSpec((None, channel, L, Ht * E), lambda b, h: (b, 0, 0, h))

    def out_spec(L):
        return pl.BlockSpec((None, Ht, L, L), lambda b, h: (b, h, 0, 0))

    kernel = functools.partial(
        _dac_fused_kernel, scale_ps=scale_ps, scale_pn=scale_pn,
        heads_per_block=Ht, e_ps=E_ps, e_pn=E_pn, channel=channel, unroll=unroll)

    attn_ps, attn_pn = pl.pallas_call(
        kernel,
        out_shape=(jax.ShapeDtypeStruct((B, H, L_ps, L_ps), jnp.float32),
                   jax.ShapeDtypeStruct((B, H, L_pn, L_pn), jnp.float32)),
        grid=grid,
        in_specs=[in_spec(L_ps, E_ps), in_spec(L_ps, E_ps),
                  in_spec(L_pn, E_pn), in_spec(L_pn, E_pn)],
        out_specs=(out_spec(L_ps), out_spec(L_pn)),
        scratch_shapes=[pltpu.VMEM((Ht, L_ps, L_ps), jnp.float32),
                        pltpu.VMEM((Ht, L_pn, L_pn), jnp.float32)],
        compiler_params=pltpu.CompilerParams(
            dimension_semantics=("parallel", "parallel"),
            vmem_limit_bytes=vmem_limit),
    )(qps, kps, qpn, kpn)

    # nn.Dropout(p=0.05) in eval mode == identity.
    # TODO(synk): train-mode dropout RNG not implemented.

    p = patch_size[patch_index]
    rep = win_size // p

    # Mean-over-channel commutes with both expansions, so we expand the already
    # channel-reduced (B, H, L, L) maps: ~channel*p^2 (resp. channel*rep^2) less
    # HBM traffic than expanding first.
    series_ps = _upsample_last2(attn_ps, p)            # einops.repeat (repeat_interleave)
    series_pn = jnp.tile(attn_pn, (1, 1, rep, rep))    # torch .repeat tiling

    return series_ps, series_pn


# ---------------------------------------------------------------------------
# Pure-JAX reference (mirrors the PyTorch code 1:1) for the correctness check
# ---------------------------------------------------------------------------
def _reference(q_ps, q_pn, k_ps, k_pn, patch_index, win_size, patch_size, channel):
    E_ps = q_ps.shape[-1]
    E_pn = q_pn.shape[-1]
    a_ps = jax.nn.softmax(jnp.einsum('blhe,bshe->bhls', q_ps, k_ps) / math.sqrt(E_ps), axis=-1)
    a_pn = jax.nn.softmax(jnp.einsum('blhe,bshe->bhls', q_pn, k_pn) / math.sqrt(E_pn), axis=-1)
    p = patch_size[patch_index]
    rep = win_size // p
    s_ps = jnp.repeat(jnp.repeat(a_ps, p, axis=2), p, axis=3)
    s_pn = jnp.tile(a_pn, (1, 1, rep, rep))
    B = q_ps.shape[0] // channel

    def red(x):
        b_tot, h, w, _ = x.shape
        return x.reshape(B, channel, h, w, w).mean(axis=1)

    return red(s_ps), red(s_pn)


def _run_case(key, B, channel, H, E, win_size, patch_size, patch_index,
              compute_dtype=None, tol=5e-3):
    p = patch_size[patch_index]
    L_ps = win_size // p
    L_pn = p
    B_tot = B * channel
    ks = jax.random.split(key, 5)
    q_ps = jax.random.normal(ks[0], (B_tot, L_ps, H, E), jnp.float32)
    k_ps = jax.random.normal(ks[1], (B_tot, L_ps, H, E), jnp.float32)
    q_pn = jax.random.normal(ks[2], (B_tot, L_pn, H, E), jnp.float32)
    k_pn = jax.random.normal(ks[3], (B_tot, L_pn, H, E), jnp.float32)
    values = jax.random.normal(ks[4], (B_tot, L_ps, H, E), jnp.float32)  # unused (as in PyTorch)

    out_ps, out_pn = dac_structure_forward(
        q_ps, q_pn, k_ps, k_pn, values, patch_index, None,
        win_size=win_size, patch_size=patch_size, channel=channel,
        compute_dtype=compute_dtype)
    jax.block_until_ready((out_ps, out_pn))

    ref_ps, ref_pn = _reference(q_ps, q_pn, k_ps, k_pn, patch_index,
                                win_size, patch_size, channel)
    np.testing.assert_allclose(np.asarray(out_ps), np.asarray(ref_ps), atol=tol, rtol=tol)
    np.testing.assert_allclose(np.asarray(out_pn), np.asarray(ref_pn), atol=tol, rtol=tol)
    assert out_ps.shape == (B, H, win_size, win_size)
    assert out_pn.shape == (B, H, win_size, win_size)


if __name__ == "__main__":
    key = jax.random.PRNGKey(0)
    k1, k2, k3 = jax.random.split(key, 3)

    # Small, module-consistent shapes (f32 path, Ht == H)
    _run_case(k1, B=2, channel=4, H=2, E=16, win_size=8, patch_size=[2, 4], patch_index=0)
    # Second config: patch_num tiling path, H*E == 128
    _run_case(k2, B=2, channel=3, H=4, E=32, win_size=32, patch_size=[4, 8], patch_index=1)
    # Third config: B==1 so the picker splits heads into 2 blocks; bf16 input path
    _run_case(k3, B=1, channel=5, H=8, E=32, win_size=16, patch_size=[2, 4], patch_index=1,
              compute_dtype=jnp.bfloat16, tol=3e-2)

    print("KERNEL_OK")
</pallas_src>

<mosaic_0001>
module attributes {stable_mosaic.version = 11 : i64} {
  func.func @_dac_fused_kernel(%arg0: i32, %arg1: i32, %arg2: memref<1x4x4x32xf32, #tpu.memory_space<vmem>>, %arg3: memref<1x4x4x32xf32, #tpu.memory_space<vmem>>, %arg4: memref<1x4x2x32xf32, #tpu.memory_space<vmem>>, %arg5: memref<1x4x2x32xf32, #tpu.memory_space<vmem>>, %arg6: memref<1x2x4x4xf32, #tpu.memory_space<vmem>>, %arg7: memref<1x2x2x2xf32, #tpu.memory_space<vmem>>, %arg8: memref<2x4x4xf32, #tpu.memory_space<vmem>>, %arg9: memref<2x2x2xf32, #tpu.memory_space<vmem>>) attributes {dimension_semantics = [#tpu.dimension_semantics<parallel>, #tpu.dimension_semantics<parallel>], iteration_bounds = array<i64: 2, 1>, scalar_prefetch = 0 : i64, scratch_operands = 2 : i64, tpu.core_type = #tpu.core_type<tc>, window_params = [{transform_indices = @transform_0, window_bounds = array<i64: 1, 4, 4, 32>}, {transform_indices = @transform_1, window_bounds = array<i64: 1, 4, 4, 32>}, {transform_indices = @transform_2, window_bounds = array<i64: 1, 4, 2, 32>}, {transform_indices = @transform_3, window_bounds = array<i64: 1, 4, 2, 32>}, {transform_indices = @transform_4, window_bounds = array<i64: 1, 2, 4, 4>}, {transform_indices = @transform_5, window_bounds = array<i64: 1, 2, 2, 2>}]} {
    %cst = arith.constant 0.000000e+00 : f32
    %0 = vector.broadcast %cst : f32 to vector<2x4x4xf32>
    %c0 = arith.constant 0 : index
    %c0_0 = arith.constant 0 : index
    %c0_1 = arith.constant 0 : index
    %1 = vector.load %arg8[%c0, %c0_0, %c0_1] : memref<2x4x4xf32, #tpu.memory_space<vmem>>, vector<2x4x4xf32>
    tpu.vector_store %arg8[%c0, %c0_0, %c0_1], %0 {strides = array<i32>} : memref<2x4x4xf32, #tpu.memory_space<vmem>>, vector<2x4x4xf32>,
    %cst_2 = arith.constant 0.000000e+00 : f32
    %2 = vector.broadcast %cst_2 : f32 to vector<2x2x2xf32>
    %c0_3 = arith.constant 0 : index
    %c0_4 = arith.constant 0 : index
    %c0_5 = arith.constant 0 : index
    %3 = vector.load %arg9[%c0_3, %c0_4, %c0_5] : memref<2x2x2xf32, #tpu.memory_space<vmem>>, vector<2x2x2xf32>
    tpu.vector_store %arg9[%c0_3, %c0_4, %c0_5], %2 {strides = array<i32>} : memref<2x2x2xf32, #tpu.memory_space<vmem>>, vector<2x2x2xf32>,
    %cst_6 = arith.constant 2.500000e-01 : f32
    %c0_i32 = arith.constant 0 : i32
    %c0_7 = arith.constant 0 : index
    %4 = arith.index_cast %c0_i32 : i32 to index
    %c0_8 = arith.constant 0 : index
    %c0_9 = arith.constant 0 : index
    %5 = vector.load %arg2[%c0_7, %4, %c0_8, %c0_9] : memref<1x4x4x32xf32, #tpu.memory_space<vmem>>, vector<1x1x4x32xf32>
    %6 = vector.shape_cast %5 : vector<1x1x4x32xf32> to vector<4x32xf32>
    %c0_10 = arith.constant 0 : index
    %7 = arith.index_cast %c0_i32 : i32 to index
    %c0_11 = arith.constant 0 : index
    %c0_12 = arith.constant 0 : index
    %8 = vector.load %arg3[%c0_10, %7, %c0_11, %c0_12] : memref<1x4x4x32xf32, #tpu.memory_space<vmem>>, vector<1x1x4x32xf32>
    %9 = vector.shape_cast %8 : vector<1x1x4x32xf32> to vector<4x32xf32>
    %10 = vector.extract_strided_slice %6 {offsets = [0, 0], sizes = [4, 16], strides = [1, 1]} : vector<4x32xf32> to vector<4x16xf32>
    %11 = vector.extract_strided_slice %9 {offsets = [0, 0], sizes = [4, 16], strides = [1, 1]} : vector<4x32xf32> to vector<4x16xf32>
    %cst_13 = arith.constant dense<0.000000e+00> : vector<4x4xf32>
    %12 = tpu.matmul %10, %11, %cst_13 {dimension_numbers = #tpu.dot_dimension_numbers<[1], [1], [0], [0], [0, 0, 1, 0], [], []>} : vector<4x16xf32>, vector<4x16xf32>, vector<4x4xf32> -> vector<4x4xf32>
    %cst_14 = arith.constant 2.500000e-01 : f32
    %13 = vector.broadcast %cst_14 : f32 to vector<4x4xf32>
    %14 = arith.mulf %12, %13 : vector<4x4xf32>
    %cst_15 = arith.constant dense<0xFF800000> : vector<4xf32>
    %15 = vector.multi_reduction <maximumf>, %14, %cst_15 [1] : vector<4x4xf32> to vector<4xf32>
    %16 = vector.shape_cast %15 : vector<4xf32> to vector<4x1xf32>
    %17 = vector.broadcast %16 : vector<4x1xf32> to vector<4x4xf32>
    %18 = arith.subf %14, %17 : vector<4x4xf32>
    %19 = math.exp %18 : vector<4x4xf32>
    %cst_16 = arith.constant dense<0.000000e+00> : vector<4xf32>
    %20 = vector.multi_reduction <add>, %19, %cst_16 [1] : vector<4x4xf32> to vector<4xf32>
    %21 = vector.shape_cast %20 : vector<4xf32> to vector<4x1xf32>
    %22 = vector.broadcast %21 : vector<4x1xf32> to vector<4x4xf32>
    %23 = arith.divf %19, %22 : vector<4x4xf32>
    %c0_17 = arith.constant 0 : index
    %c0_18 = arith.constant 0 : index
    %c0_19 = arith.constant 0 : index
    %24 = vector.load %arg8[%c0_17, %c0_18, %c0_19] : memref<2x4x4xf32, #tpu.memory_space<vmem>>, vector<1x4x4xf32>
    %25 = vector.shape_cast %24 : vector<1x4x4xf32> to vector<4x4xf32>
    %26 = vector.broadcast %cst_6 : f32 to vector<4x4xf32>
    %27 = arith.mulf %23, %26 : vector<4x4xf32>
    %28 = arith.addf %25, %27 : vector<4x4xf32>
    %c0_20 = arith.constant 0 : index
    %c0_21 = arith.constant 0 : index
    %c0_22 = arith.constant 0 : index
    %29 = vector.load %arg8[%c0_20, %c0_21, %c0_22] : memref<2x4x4xf32, #tpu.memory_space<vmem>>, vector<1x4x4xf32>
    %30 = vector.shape_cast %29 : vector<1x4x4xf32> to vector<4x4xf32>
    %31 = vector.shape_cast %28 : vector<4x4xf32> to vector<1x4x4xf32>
    tpu.vector_store %arg8[%c0_20, %c0_21, %c0_22], %31 {strides = array<i32>} : memref<2x4x4xf32, #tpu.memory_space<vmem>>, vector<1x4x4xf32>,
    %32 = vector.extract_strided_slice %6 {offsets = [0, 16], sizes = [4, 16], strides = [1, 1]} : vector<4x32xf32> to vector<4x16xf32>
    %33 = vector.extract_strided_slice %9 {offsets = [0, 16], sizes = [4, 16], strides = [1, 1]} : vector<4x32xf32> to vector<4x16xf32>
    %cst_23 = arith.constant dense<0.000000e+00> : vector<4x4xf32>
    %34 = tpu.matmul %32, %33, %cst_23 {dimension_numbers = #tpu.dot_dimension_numbers<[1], [1], [0], [0], [0, 0, 1, 0], [], []>} : vector<4x16xf32>, vector<4x16xf32>, vector<4x4xf32> -> vector<4x4xf32>
    %cst_24 = arith.constant 2.500000e-01 : f32
    %35 = vector.broadcast %cst_24 : f32 to vector<4x4xf32>
    %36 = arith.mulf %34, %35 : vector<4x4xf32>
    %cst_25 = arith.constant dense<0xFF800000> : vector<4xf32>
    %37 = vector.multi_reduction <maximumf>, %36, %cst_25 [1] : vector<4x4xf32> to vector<4xf32>
    %38 = vector.shape_cast %37 : vector<4xf32> to vector<4x1xf32>
    %39 = vector.broadcast %38 : vector<4x1xf32> to vector<4x4xf32>
    %40 = arith.subf %36, %39 : vector<4x4xf32>
    %41 = math.exp %40 : vector<4x4xf32>
    %cst_26 = arith.constant dense<0.000000e+00> : vector<4xf32>
    %42 = vector.multi_reduction <add>, %41, %cst_26 [1] : vector<4x4xf32> to vector<4xf32>
    %43 = vector.shape_cast %42 : vector<4xf32> to vector<4x1xf32>
    %44 = vector.broadcast %43 : vector<4x1xf32> to vector<4x4xf32>
    %45 = arith.divf %41, %44 : vector<4x4xf32>
    %c1 = arith.constant 1 : index
    %c0_27 = arith.constant 0 : index
    %c0_28 = arith.constant 0 : index
    %46 = vector.load %arg8[%c1, %c0_27, %c0_28] : memref<2x4x4xf32, #tpu.memory_space<vmem>>, vector<1x4x4xf32>
    %47 = vector.shape_cast %46 : vector<1x4x4xf32> to vector<4x4xf32>
    %48 = vector.broadcast %cst_6 : f32 to vector<4x4xf32>
    %49 = arith.mulf %45, %48 : vector<4x4xf32>
    %50 = arith.addf %47, %49 : vector<4x4xf32>
    %c1_29 = arith.constant 1 : index
    %c0_30 = arith.constant 0 : index
    %c0_31 = arith.constant 0 : index
    %51 = vector.load %arg8[%c1_29, %c0_30, %c0_31] : memref<2x4x4xf32, #tpu.memory_space<vmem>>, vector<1x4x4xf32>
    %52 = vector.shape_cast %51 : vector<1x4x4xf32> to vector<4x4xf32>
    %53 = vector.shape_cast %50 : vector<4x4xf32> to vector<1x4x4xf32>
    tpu.vector_store %arg8[%c1_29, %c0_30, %c0_31], %53 {strides = array<i32>} : memref<2x4x4xf32, #tpu.memory_space<vmem>>, vector<1x4x4xf32>,
    %c0_32 = arith.constant 0 : index
    %54 = arith.index_cast %c0_i32 : i32 to index
    %c0_33 = arith.constant 0 : index
    %c0_34 = arith.constant 0 : index
    %55 = vector.load %arg4[%c0_32, %54, %c0_33, %c0_34] : memref<1x4x2x32xf32, #tpu.memory_space<vmem>>, vector<1x1x2x32xf32>
    %56 = vector.shape_cast %55 : vector<1x1x2x32xf32> to vector<2x32xf32>
    %c0_35 = arith.constant 0 : index
    %57 = arith.index_cast %c0_i32 : i32 to index
    %c0_36 = arith.constant 0 : index
    %c0_37 = arith.constant 0 : index
    %58 = vector.load %arg5[%c0_35, %57, %c0_36, %c0_37] : memref<1x4x2x32xf32, #tpu.memory_space<vmem>>, vector<1x1x2x32xf32>
    %59 = vector.shape_cast %58 : vector<1x1x2x32xf32> to vector<2x32xf32>
    %60 = vector.extract_strided_slice %56 {offsets = [0, 0], sizes = [2, 16], strides = [1, 1]} : vector<2x32xf32> to vector<2x16xf32>
    %61 = vector.extract_strided_slice %59 {offsets = [0, 0], sizes = [2, 16], strides = [1, 1]} : vector<2x32xf32> to vector<2x16xf32>
    %cst_38 = arith.constant dense<0.000000e+00> : vector<2x2xf32>
    %62 = tpu.matmul %60, %61, %cst_38 {dimension_numbers = #tpu.dot_dimension_numbers<[1], [1], [0], [0], [0, 0, 1, 0], [], []>} : vector<2x16xf32>, vector<2x16xf32>, vector<2x2xf32> -> vector<2x2xf32>
    %cst_39 = arith.constant 2.500000e-01 : f32
    %63 = vector.broadcast %cst_39 : f32 to vector<2x2xf32>
    %64 = arith.mulf %62, %63 : vector<2x2xf32>
    %cst_40 = arith.constant dense<0xFF800000> : vector<2xf32>
    %65 = vector.multi_reduction <maximumf>, %64, %cst_40 [1] : vector<2x2xf32> to vector<2xf32>
    %66 = vector.shape_cast %65 : vector<2xf32> to vector<2x1xf32>
    %67 = vector.broadcast %66 : vector<2x1xf32> to vector<2x2xf32>
    %68 = arith.subf %64, %67 : vector<2x2xf32>
    %69 = math.exp %68 : vector<2x2xf32>
    %cst_41 = arith.constant dense<0.000000e+00> : vector<2xf32>
    %70 = vector.multi_reduction <add>, %69, %cst_41 [1] : vector<2x2xf32> to vector<2xf32>
    %71 = vector.shape_cast %70 : vector<2xf32> to vector<2x1xf32>
    %72 = vector.broadcast %71 : vector<2x1xf32> to vector<2x2xf32>
    %73 = arith.divf %69, %72 : vector<2x2xf32>
    %c0_42 = arith.constant 0 : index
    %c0_43 = arith.constant 0 : index
    %c0_44 = arith.constant 0 : index
    %74 = vector.load %arg9[%c0_42, %c0_43, %c0_44] : memref<2x2x2xf32, #tpu.memory_space<vmem>>, vector<1x2x2xf32>
    %75 = vector.shape_cast %74 : vector<1x2x2xf32> to vector<2x2xf32>
    %76 = vector.broadcast %cst_6 : f32 to vector<2x2xf32>
    %77 = arith.mulf %73, %76 : vector<2x2xf32>
    %78 = arith.addf %75, %77 : vector<2x2xf32>
    %c0_45 = arith.constant 0 : index
    %c0_46 = arith.constant 0 : index
    %c0_47 = arith.constant 0 : index
    %79 = vector.load %arg9[%c0_45, %c0_46, %c0_47] : memref<2x2x2xf32, #tpu.memory_space<vmem>>, vector<1x2x2xf32>
    %80 = vector.shape_cast %79 : vector<1x2x2xf32> to vector<2x2xf32>
    %81 = vector.shape_cast %78 : vector<2x2xf32> to vector<1x2x2xf32>
    tpu.vector_store %arg9[%c0_45, %c0_46, %c0_47], %81 {strides = array<i32>} : memref<2x2x2xf32, #tpu.memory_space<vmem>>, vector<1x2x2xf32>,
    %82 = vector.extract_strided_slice %56 {offsets = [0, 16], sizes = [2, 16], strides = [1, 1]} : vector<2x32xf32> to vector<2x16xf32>
    %83 = vector.extract_strided_slice %59 {offsets = [0, 16], sizes = [2, 16], strides = [1, 1]} : vector<2x32xf32> to vector<2x16xf32>
    %cst_48 = arith.constant dense<0.000000e+00> : vector<2x2xf32>
    %84 = tpu.matmul %82, %83, %cst_48 {dimension_numbers = #tpu.dot_dimension_numbers<[1], [1], [0], [0], [0, 0, 1, 0], [], []>} : vector<2x16xf32>, vector<2x16xf32>, vector<2x2xf32> -> vector<2x2xf32>
    %cst_49 = arith.constant 2.500000e-01 : f32
    %85 = vector.broadcast %cst_49 : f32 to vector<2x2xf32>
    %86 = arith.mulf %84, %85 : vector<2x2xf32>
    %cst_50 = arith.constant dense<0xFF800000> : vector<2xf32>
    %87 = vector.multi_reduction <maximumf>, %86, %cst_50 [1] : vector<2x2xf32> to vector<2xf32>
    %88 = vector.shape_cast %87 : vector<2xf32> to vector<2x1xf32>
    %89 = vector.broadcast %88 : vector<2x1xf32> to vector<2x2xf32>
    %90 = arith.subf %86, %89 : vector<2x2xf32>
    %91 = math.exp %90 : vector<2x2xf32>
    %cst_51 = arith.constant dense<0.000000e+00> : vector<2xf32>
    %92 = vector.multi_reduction <add>, %91, %cst_51 [1] : vector<2x2xf32> to vector<2xf32>
    %93 = vector.shape_cast %92 : vector<2xf32> to vector<2x1xf32>
    %94 = vector.broadcast %93 : vector<2x1xf32> to vector<2x2xf32>
    %95 = arith.divf %91, %94 : vector<2x2xf32>
    %c1_52 = arith.constant 1 : index
    %c0_53 = arith.constant 0 : index
    %c0_54 = arith.constant 0 : index
    %96 = vector.load %arg9[%c1_52, %c0_53, %c0_54] : memref<2x2x2xf32, #tpu.memory_space<vmem>>, vector<1x2x2xf32>
    %97 = vector.shape_cast %96 : vector<1x2x2xf32> to vector<2x2xf32>
    %98 = vector.broadcast %cst_6 : f32 to vector<2x2xf32>
    %99 = arith.mulf %95, %98 : vector<2x2xf32>
    %100 = arith.addf %97, %99 : vector<2x2xf32>
    %c1_55 = arith.constant 1 : index
    %c0_56 = arith.constant 0 : index
    %c0_57 = arith.constant 0 : index
    %101 = vector.load %arg9[%c1_55, %c0_56, %c0_57] : memref<2x2x2xf32, #tpu.memory_space<vmem>>, vector<1x2x2xf32>
    %102 = vector.shape_cast %101 : vector<1x2x2xf32> to vector<2x2xf32>
    %103 = vector.shape_cast %100 : vector<2x2xf32> to vector<1x2x2xf32>
    tpu.vector_store %arg9[%c1_55, %c0_56, %c0_57], %103 {strides = array<i32>} : memref<2x2x2xf32, #tpu.memory_space<vmem>>, vector<1x2x2xf32>,
    %c1_i32 = arith.constant 1 : i32
    %c0_58 = arith.constant 0 : index
    %104 = arith.index_cast %c1_i32 : i32 to index
    %c0_59 = arith.constant 0 : index
    %c0_60 = arith.constant 0 : index
    %105 = vector.load %arg2[%c0_58, %104, %c0_59, %c0_60] : memref<1x4x4x32xf32, #tpu.memory_space<vmem>>, vector<1x1x4x32xf32>
    %106 = vector.shape_cast %105 : vector<1x1x4x32xf32> to vector<4x32xf32>
    %c0_61 = arith.constant 0 : index
    %107 = arith.index_cast %c1_i32 : i32 to index
    %c0_62 = arith.constant 0 : index
    %c0_63 = arith.constant 0 : index
    %108 = vector.load %arg3[%c0_61, %107, %c0_62, %c0_63] : memref<1x4x4x32xf32, #tpu.memory_space<vmem>>, vector<1x1x4x32xf32>
    %109 = vector.shape_cast %108 : vector<1x1x4x32xf32> to vector<4x32xf32>
    %110 = vector.extract_strided_slice %106 {offsets = [0, 0], sizes = [4, 16], strides = [1, 1]} : vector<4x32xf32> to vector<4x16xf32>
    %111 = vector.extract_strided_slice %109 {offsets = [0, 0], sizes = [4, 16], strides = [1, 1]} : vector<4x32xf32> to vector<4x16xf32>
    %cst_64 = arith.constant dense<0.000000e+00> : vector<4x4xf32>
    %112 = tpu.matmul %110, %111, %cst_64 {dimension_numbers = #tpu.dot_dimension_numbers<[1], [1], [0], [0], [0, 0, 1, 0], [], []>} : vector<4x16xf32>, vector<4x16xf32>, vector<4x4xf32> -> vector<4x4xf32>
    %cst_65 = arith.constant 2.500000e-01 : f32
    %113 = vector.broadcast %cst_65 : f32 to vector<4x4xf32>
    %114 = arith.mulf %112, %113 : vector<4x4xf32>
    %cst_66 = arith.constant dense<0xFF800000> : vector<4xf32>
    %115 = vector.multi_reduction <maximumf>, %114, %cst_66 [1] : vector<4x4xf32> to vector<4xf32>
    %116 = vector.shape_cast %115 : vector<4xf32> to vector<4x1xf32>
    %117 = vector.broadcast %116 : vector<4x1xf32> to vector<4x4xf32>
    %118 = arith.subf %114, %117 : vector<4x4xf32>
    %119 = math.exp %118 : vector<4x4xf32>
    %cst_67 = arith.constant dense<0.000000e+00> : vector<4xf32>
    %120 = vector.multi_reduction <add>, %119, %cst_67 [1] : vector<4x4xf32> to vector<4xf32>
    %121 = vector.shape_cast %120 : vector<4xf32> to vector<4x1xf32>
    %122 = vector.broadcast %121 : vector<4x1xf32> to vector<4x4xf32>
    %123 = arith.divf %119, %122 : vector<4x4xf32>
    %c0_68 = arith.constant 0 : index
    %c0_69 = arith.constant 0 : index
    %c0_70 = arith.constant 0 : index
    %124 = vector.load %arg8[%c0_68, %c0_69, %c0_70] : memref<2x4x4xf32, #tpu.memory_space<vmem>>, vector<1x4x4xf32>
    %125 = vector.shape_cast %124 : vector<1x4x4xf32> to vector<4x4xf32>
    %126 = vector.broadcast %cst_6 : f32 to vector<4x4xf32>
    %127 = arith.mulf %123, %126 : vector<4x4xf32>
    %128 = arith.addf %125, %127 : vector<4x4xf32>
    %c0_71 = arith.constant 0 : index
    %c0_72 = arith.constant 0 : index
    %c0_73 = arith.constant 0 : index
    %129 = vector.load %arg8[%c0_71, %c0_72, %c0_73] : memref<2x4x4xf32, #tpu.memory_space<vmem>>, vector<1x4x4xf32>
    %130 = vector.shape_cast %129 : vector<1x4x4xf32> to vector<4x4xf32>
    %131 = vector.shape_cast %128 : vector<4x4xf32> to vector<1x4x4xf32>
    tpu.vector_store %arg8[%c0_71, %c0_72, %c0_73], %131 {strides = array<i32>} : memref<2x4x4xf32, #tpu.memory_space<vmem>>, vector<1x4x4xf32>,
    %132 = vector.extract_strided_slice %106 {offsets = [0, 16], sizes = [4, 16], strides = [1, 1]} : vector<4x32xf32> to vector<4x16xf32>
    %133 = vector.extract_strided_slice %109 {offsets = [0, 16], sizes = [4, 16], strides = [1, 1]} : vector<4x32xf32> to vector<4x16xf32>
    %cst_74 = arith.constant dense<0.000000e+00> : vector<4x4xf32>
    %134 = tpu.matmul %132, %133, %cst_74 {dimension_numbers = #tpu.dot_dimension_numbers<[1], [1], [0], [0], [0, 0, 1, 0], [], []>} : vector<4x16xf32>, vector<4x16xf32>, vector<4x4xf32> -> vector<4x4xf32>
    %cst_75 = arith.constant 2.500000e-01 : f32
    %135 = vector.broadcast %cst_75 : f32 to vector<4x4xf32>
    %136 = arith.mulf %134, %135 : vector<4x4xf32>
    %cst_76 = arith.constant dense<0xFF800000> : vector<4xf32>
    %137 = vector.multi_reduction <maximumf>, %136, %cst_76 [1] : vector<4x4xf32> to vector<4xf32>
    %138 = vector.shape_cast %137 : vector<4xf32> to vector<4x1xf32>
    %139 = vector.broadcast %138 : vector<4x1xf32> to vector<4x4xf32>
    %140 = arith.subf %136, %139 : vector<4x4xf32>
    %141 = math.exp %140 : vector<4x4xf32>
    %cst_77 = arith.constant dense<0.000000e+00> : vector<4xf32>
    %142 = vector.multi_reduction <add>, %141, %cst_77 [1] : vector<4x4xf32> to vector<4xf32>
    %143 = vector.shape_cast %142 : vector<4xf32> to vector<4x1xf32>
    %144 = vector.broadcast %143 : vector<4x1xf32> to vector<4x4xf32>
    %145 = arith.divf %141, %144 : vector<4x4xf32>
    %c1_78 = arith.constant 1 : index
    %c0_79 = arith.constant 0 : index
    %c0_80 = arith.constant 0 : index
    %146 = vector.load %arg8[%c1_78, %c0_79, %c0_80] : memref<2x4x4xf32, #tpu.memory_space<vmem>>, vector<1x4x4xf32>
    %147 = vector.shape_cast %146 : vector<1x4x4xf32> to vector<4x4xf32>
    %148 = vector.broadcast %cst_6 : f32 to vector<4x4xf32>
    %149 = arith.mulf %145, %148 : vector<4x4xf32>
    %150 = arith.addf %147, %149 : vector<4x4xf32>
    %c1_81 = arith.constant 1 : index
    %c0_82 = arith.constant 0 : index
    %c0_83 = arith.constant 0 : index
    %151 = vector.load %arg8[%c1_81, %c0_82, %c0_83] : memref<2x4x4xf32, #tpu.memory_space<vmem>>, vector<1x4x4xf32>
    %152 = vector.shape_cast %151 : vector<1x4x4xf32> to vector<4x4xf32>
    %153 = vector.shape_cast %150 : vector<4x4xf32> to vector<1x4x4xf32>
    tpu.vector_store %arg8[%c1_81, %c0_82, %c0_83], %153 {strides = array<i32>} : memref<2x4x4xf32, #tpu.memory_space<vmem>>, vector<1x4x4xf32>,
    %c0_84 = arith.constant 0 : index
    %154 = arith.index_cast %c1_i32 : i32 to index
    %c0_85 = arith.constant 0 : index
    %c0_86 = arith.constant 0 : index
    %155 = vector.load %arg4[%c0_84, %154, %c0_85, %c0_86] : memref<1x4x2x32xf32, #tpu.memory_space<vmem>>, vector<1x1x2x32xf32>
    %156 = vector.shape_cast %155 : vector<1x1x2x32xf32> to vector<2x32xf32>
    %c0_87 = arith.constant 0 : index
    %157 = arith.index_cast %c1_i32 : i32 to index
    %c0_88 = arith.constant 0 : index
    %c0_89 = arith.constant 0 : index
    %158 = vector.load %arg5[%c0_87, %157, %c0_88, %c0_89] : memref<1x4x2x32xf32, #tpu.memory_space<vmem>>, vector<1x1x2x32xf32>
    %159 = vector.shape_cast %158 : vector<1x1x2x32xf32> to vector<2x32xf32>
    %160 = vector.extract_strided_slice %156 {offsets = [0, 0], sizes = [2, 16], strides = [1, 1]} : vector<2x32xf32> to vector<2x16xf32>
    %161 = vector.extract_strided_slice %159 {offsets = [0, 0], sizes = [2, 16], strides = [1, 1]} : vector<2x32xf32> to vector<2x16xf32>
    %cst_90 = arith.constant dense<0.000000e+00> : vector<2x2xf32>
    %162 = tpu.matmul %160, %161, %cst_90 {dimension_numbers = #tpu.dot_dimension_numbers<[1], [1], [0], [0], [0, 0, 1, 0], [], []>} : vector<2x16xf32>, vector<2x16xf32>, vector<2x2xf32> -> vector<2x2xf32>
    %cst_91 = arith.constant 2.500000e-01 : f32
    %163 = vector.broadcast %cst_91 : f32 to vector<2x2xf32>
    %164 = arith.mulf %162, %163 : vector<2x2xf32>
    %cst_92 = arith.constant dense<0xFF800000> : vector<2xf32>
    %165 = vector.multi_reduction <maximumf>, %164, %cst_92 [1] : vector<2x2xf32> to vector<2xf32>
    %166 = vector.shape_cast %165 : vector<2xf32> to vector<2x1xf32>
    %167 = vector.broadcast %166 : vector<2x1xf32> to vector<2x2xf32>
    %168 = arith.subf %164, %167 : vector<2x2xf32>
    %169 = math.exp %168 : vector<2x2xf32>
    %cst_93 = arith.constant dense<0.000000e+00> : vector<2xf32>
    %170 = vector.multi_reduction <add>, %169, %cst_93 [1] : vector<2x2xf32> to vector<2xf32>
    %171 = vector.shape_cast %170 : vector<2xf32> to vector<2x1xf32>
    %172 = vector.broadcast %171 : vector<2x1xf32> to vector<2x2xf32>
    %173 = arith.divf %169, %172 : vector<2x2xf32>
    %c0_94 = arith.constant 0 : index
    %c0_95 = arith.constant 0 : index
    %c0_96 = arith.constant 0 : index
    %174 = vector.load %arg9[%c0_94, %c0_95, %c0_96] : memref<2x2x2xf32, #tpu.memory_space<vmem>>, vector<1x2x2xf32>
    %175 = vector.shape_cast %174 : vector<1x2x2xf32> to vector<2x2xf32>
    %176 = vector.broadcast %cst_6 : f32 to vector<2x2xf32>
    %177 = arith.mulf %173, %176 : vector<2x2xf32>
    %178 = arith.addf %175, %177 : vector<2x2xf32>
    %c0_97 = arith.constant 0 : index
    %c0_98 = arith.constant 0 : index
    %c0_99 = arith.constant 0 : index
    %179 = vector.load %arg9[%c0_97, %c0_98, %c0_99] : memref<2x2x2xf32, #tpu.memory_space<vmem>>, vector<1x2x2xf32>
    %180 = vector.shape_cast %179 : vector<1x2x2xf32> to vector<2x2xf32>
    %181 = vector.shape_cast %178 : vector<2x2xf32> to vector<1x2x2xf32>
    tpu.vector_store %arg9[%c0_97, %c0_98, %c0_99], %181 {strides = array<i32>} : memref<2x2x2xf32, #tpu.memory_space<vmem>>, vector<1x2x2xf32>,
    %182 = vector.extract_strided_slice %156 {offsets = [0, 16], sizes = [2, 16], strides = [1, 1]} : vector<2x32xf32> to vector<2x16xf32>
    %183 = vector.extract_strided_slice %159 {offsets = [0, 16], sizes = [2, 16], strides = [1, 1]} : vector<2x32xf32> to vector<2x16xf32>
    %cst_100 = arith.constant dense<0.000000e+00> : vector<2x2xf32>
    %184 = tpu.matmul %182, %183, %cst_100 {dimension_numbers = #tpu.dot_dimension_numbers<[1], [1], [0], [0], [0, 0, 1, 0], [], []>} : vector<2x16xf32>, vector<2x16xf32>, vector<2x2xf32> -> vector<2x2xf32>
    %cst_101 = arith.constant 2.500000e-01 : f32
    %185 = vector.broadcast %cst_101 : f32 to vector<2x2xf32>
    %186 = arith.mulf %184, %185 : vector<2x2xf32>
    %cst_102 = arith.constant dense<0xFF800000> : vector<2xf32>
    %187 = vector.multi_reduction <maximumf>, %186, %cst_102 [1] : vector<2x2xf32> to vector<2xf32>
    %188 = vector.shape_cast %187 : vector<2xf32> to vector<2x1xf32>
    %189 = vector.broadcast %188 : vector<2x1xf32> to vector<2x2xf32>
    %190 = arith.subf %186, %189 : vector<2x2xf32>
    %191 = math.exp %190 : vector<2x2xf32>
    %cst_103 = arith.constant dense<0.000000e+00> : vector<2xf32>
    %192 = vector.multi_reduction <add>, %191, %cst_103 [1] : vector<2x2xf32> to vector<2xf32>
    %193 = vector.shape_cast %192 : vector<2xf32> to vector<2x1xf32>
    %194 = vector.broadcast %193 : vector<2x1xf32> to vector<2x2xf32>
    %195 = arith.divf %191, %194 : vector<2x2xf32>
    %c1_104 = arith.constant 1 : index
    %c0_105 = arith.constant 0 : index
    %c0_106 = arith.constant 0 : index
    %196 = vector.load %arg9[%c1_104, %c0_105, %c0_106] : memref<2x2x2xf32, #tpu.memory_space<vmem>>, vector<1x2x2xf32>
    %197 = vector.shape_cast %196 : vector<1x2x2xf32> to vector<2x2xf32>
    %198 = vector.broadcast %cst_6 : f32 to vector<2x2xf32>
    %199 = arith.mulf %195, %198 : vector<2x2xf32>
    %200 = arith.addf %197, %199 : vector<2x2xf32>
    %c1_107 = arith.constant 1 : index
    %c0_108 = arith.constant 0 : index
    %c0_109 = arith.constant 0 : index
    %201 = vector.load %arg9[%c1_107, %c0_108, %c0_109] : memref<2x2x2xf32, #tpu.memory_space<vmem>>, vector<1x2x2xf32>
    %202 = vector.shape_cast %201 : vector<1x2x2xf32> to vector<2x2xf32>
    %203 = vector.shape_cast %200 : vector<2x2xf32> to vector<1x2x2xf32>
    tpu.vector_store %arg9[%c1_107, %c0_108, %c0_109], %203 {strides = array<i32>} : memref<2x2x2xf32, #tpu.memory_space<vmem>>, vector<1x2x2xf32>,
    %c2_i32 = arith.constant 2 : i32
    %c0_110 = arith.constant 0 : index
    %204 = arith.index_cast %c2_i32 : i32 to index
    %c0_111 = arith.constant 0 : index
    %c0_112 = arith.constant 0 : index
    %205 = vector.load %arg2[%c0_110, %204, %c0_111, %c0_112] : memref<1x4x4x32xf32, #tpu.memory_space<vmem>>, vector<1x1x4x32xf32>
    %206 = vector.shape_cast %205 : vector<1x1x4x32xf32> to vector<4x32xf32>
    %c0_113 = arith.constant 0 : index
    %207 = arith.index_cast %c2_i32 : i32 to index
    %c0_114 = arith.constant 0 : index
    %c0_115 = arith.constant 0 : index
    %208 = vector.load %arg3[%c0_113, %207, %c0_114, %c0_115] : memref<1x4x4x32xf32, #tpu.memory_space<vmem>>, vector<1x1x4x32xf32>
    %209 = vector.shape_cast %208 : vector<1x1x4x32xf32> to vector<4x32xf32>
    %210 = vector.extract_strided_slice %206 {offsets = [0, 0], sizes = [4, 16], strides = [1, 1]} : vector<4x32xf32> to vector<4x16xf32>
    %211 = vector.extract_strided_slice %209 {offsets = [0, 0], sizes = [4, 16], strides = [1, 1]} : vector<4x32xf32> to vector<4x16xf32>
    %cst_116 = arith.constant dense<0.000000e+00> : vector<4x4xf32>
    %212 = tpu.matmul %210, %211, %cst_116 {dimension_numbers = #tpu.dot_dimension_numbers<[1], [1], [0], [0], [0, 0, 1, 0], [], []>} : vector<4x16xf32>, vector<4x16xf32>, vector<4x4xf32> -> vector<4x4xf32>
    %cst_117 = arith.constant 2.500000e-01 : f32
    %213 = vector.broadcast %cst_117 : f32 to vector<4x4xf32>
    %214 = arith.mulf %212, %213 : vector<4x4xf32>
    %cst_118 = arith.constant dense<0xFF800000> : vector<4xf32>
    %215 = vector.multi_reduction <maximumf>, %214, %cst_118 [1] : vector<4x4xf32> to vector<4xf32>
    %216 = vector.shape_cast %215 : vector<4xf32> to vector<4x1xf32>
    %217 = vector.broadcast %216 : vector<4x1xf32> to vector<4x4xf32>
    %218 = arith.subf %214, %217 : vector<4x4xf32>
    %219 = math.exp %218 : vector<4x4xf32>
    %cst_119 = arith.constant dense<0.000000e+00> : vector<4xf32>
    %220 = vector.multi_reduction <add>, %219, %cst_119 [1] : vector<4x4xf32> to vector<4xf32>
    %221 = vector.shape_cast %220 : vector<4xf32> to vector<4x1xf32>
    %222 = vector.broadcast %221 : vector<4x1xf32> to vector<4x4xf32>
    %223 = arith.divf %219, %222 : vector<4x4xf32>
    %c0_120 = arith.constant 0 : index
    %c0_121 = arith.constant 0 : index
    %c0_122 = arith.constant 0 : index
    %224 = vector.load %arg8[%c0_120, %c0_121, %c0_122] : memref<2x4x4xf32, #tpu.memory_space<vmem>>, vector<1x4x4xf32>
    %225 = vector.shape_cast %224 : vector<1x4x4xf32> to vector<4x4xf32>
    %226 = vector.broadcast %cst_6 : f32 to vector<4x4xf32>
    %227 = arith.mulf %223, %226 : vector<4x4xf32>
    %228 = arith.addf %225, %227 : vector<4x4xf32>
    %c0_123 = arith.constant 0 : index
    %c0_124 = arith.constant 0 : index
    %c0_125 = arith.constant 0 : index
    %229 = vector.load %arg8[%c0_123, %c0_124, %c0_125] : memref<2x4x4xf32, #tpu.memory_space<vmem>>, vector<1x4x4xf32>
    %230 = vector.shape_cast %229 : vector<1x4x4xf32> to vector<4x4xf32>
    %231 = vector.shape_cast %228 : vector<4x4xf32> to vector<1x4x4xf32>
    tpu.vector_store %arg8[%c0_123, %c0_124, %c0_125], %231 {strides = array<i32>} : memref<2x4x4xf32, #tpu.memory_space<vmem>>, vector<1x4x4xf32>,
    %232 = vector.extract_strided_slice %206 {offsets = [0, 16], sizes = [4, 16], strides = [1, 1]} : vector<4x32xf32> to vector<4x16xf32>
    %233 = vector.extract_strided_slice %209 {offsets = [0, 16], sizes = [4, 16], strides = [1, 1]} : vector<4x32xf32> to vector<4x16xf32>
    %cst_126 = arith.constant dense<0.000000e+00> : vector<4x4xf32>
    %234 = tpu.matmul %232, %233, %cst_126 {dimension_numbers = #tpu.dot_dimension_numbers<[1], [1], [0], [0], [0, 0, 1, 0], [], []>} : vector<4x16xf32>, vector<4x16xf32>, vector<4x4xf32> -> vector<4x4xf32>
    %cst_127 = arith.constant 2.500000e-01 : f32
    %235 = vector.broadcast %cst_127 : f32 to vector<4x4xf32>
    %236 = arith.mulf %234, %235 : vector<4x4xf32>
    %cst_128 = arith.constant dense<0xFF800000> : vector<4xf32>
    %237 = vector.multi_reduction <maximumf>, %236, %cst_128 [1] : vector<4x4xf32> to vector<4xf32>
    %238 = vector.shape_cast %237 : vector<4xf32> to vector<4x1xf32>
    %239 = vector.broadcast %238 : vector<4x1xf32> to vector<4x4xf32>
    %240 = arith.subf %236, %239 : vector<4x4xf32>
    %241 = math.exp %240 : vector<4x4xf32>
    %cst_129 = arith.constant dense<0.000000e+00> : vector<4xf32>
    %242 = vector.multi_reduction <add>, %241, %cst_129 [1] : vector<4x4xf32> to vector<4xf32>
    %243 = vector.shape_cast %242 : vector<4xf32> to vector<4x1xf32>
    %244 = vector.broadcast %243 : vector<4x1xf32> to vector<4x4xf32>
    %245 = arith.divf %241, %244 : vector<4x4xf32>
    %c1_130 = arith.constant 1 : index
    %c0_131 = arith.constant 0 : index
    %c0_132 = arith.constant 0 : index
    %246 = vector.load %arg8[%c1_130, %c0_131, %c0_132] : memref<2x4x4xf32, #tpu.memory_space<vmem>>, vector<1x4x4xf32>
    %247 = vector.shape_cast %246 : vector<1x4x4xf32> to vector<4x4xf32>
    %248 = vector.broadcast %cst_6 : f32 to vector<4x4xf32>
    %249 = arith.mulf %245, %248 : vector<4x4xf32>
    %250 = arith.addf %247, %249 : vector<4x4xf32>
    %c1_133 = arith.constant 1 : index
    %c0_134 = arith.constant 0 : index
    %c0_135 = arith.constant 0 : index
    %251 = vector.load %arg8[%c1_133, %c0_134, %c0_135] : memref<2x4x4xf32, #tpu.memory_space<vmem>>, vector<1x4x4xf32>
    %252 = vector.shape_cast %251 : vector<1x4x4xf32> to vector<4x4xf32>
    %253 = vector.shape_cast %250 : vector<4x4xf32> to vector<1x4x4xf32>
    tpu.vector_store %arg8[%c1_133, %c0_134, %c0_135], %253 {strides = array<i32>} : memref<2x4x4xf32, #tpu.memory_space<vmem>>, vector<1x4x4xf32>,
    %c0_136 = arith.constant 0 : index
    %254 = arith.index_cast %c2_i32 : i32 to index
    %c0_137 = arith.constant 0 : index
    %c0_138 = arith.constant 0 : index
    %255 = vector.load %arg4[%c0_136, %254, %c0_137, %c0_138] : memref<1x4x2x32xf32, #tpu.memory_space<vmem>>, vector<1x1x2x32xf32>
    %256 = vector.shape_cast %255 : vector<1x1x2x32xf32> to vector<2x32xf32>
    %c0_139 = arith.constant 0 : index
    %257 = arith.index_cast %c2_i32 : i32 to index
    %c0_140 = arith.constant 0 : index
    %c0_141 = arith.constant 0 : index
    %258 = vector.load %arg5[%c0_139, %257, %c0_140, %c0_141] : memref<1x4x2x32xf32, #tpu.memory_space<vmem>>, vector<1x1x2x32xf32>
    %259 = vector.shape_cast %258 : vector<1x1x2x32xf32> to vector<2x32xf32>
    %260 = vector.extract_strided_slice %256 {offsets = [0, 0], sizes = [2, 16], strides = [1, 1]} : vector<2x32xf32> to vector<2x16xf32>
    %261 = vector.extract_strided_slice %259 {offsets = [0, 0], sizes = [2, 16], strides = [1, 1]} : vector<2x32xf32> to vector<2x16xf32>
    %cst_142 = arith.constant dense<0.000000e+00> : vector<2x2xf32>
    %262 = tpu.matmul %260, %261, %cst_142 {dimension_numbers = #tpu.dot_dimension_numbers<[1], [1], [0], [0], [0, 0, 1, 0], [], []>} : vector<2x16xf32>, vector<2x16xf32>, vector<2x2xf32> -> vector<2x2xf32>
    %cst_143 = arith.constant 2.500000e-01 : f32
    %263 = vector.broadcast %cst_143 : f32 to vector<2x2xf32>
    %264 = arith.mulf %262, %263 : vector<2x2xf32>
    %cst_144 = arith.constant dense<0xFF800000> : vector<2xf32>
    %265 = vector.multi_reduction <maximumf>, %264, %cst_144 [1] : vector<2x2xf32> to vector<2xf32>
    %266 = vector.shape_cast %265 : vector<2xf32> to vector<2x1xf32>
    %267 = vector.broadcast %266 : vector<2x1xf32> to vector<2x2xf32>
    %268 = arith.subf %264, %267 : vector<2x2xf32>
    %269 = math.exp %268 : vector<2x2xf32>
    %cst_145 = arith.constant dense<0.000000e+00> : vector<2xf32>
    %270 = vector.multi_reduction <add>, %269, %cst_145 [1] : vector<2x2xf32> to vector<2xf32>
    %271 = vector.shape_cast %270 : vector<2xf32> to vector<2x1xf32>
    %272 = vector.broadcast %271 : vector<2x1xf32> to vector<2x2xf32>
    %273 = arith.divf %269, %272 : vector<2x2xf32>
    %c0_146 = arith.constant 0 : index
    %c0_147 = arith.constant 0 : index
    %c0_148 = arith.constant 0 : index
    %274 = vector.load %arg9[%c0_146, %c0_147, %c0_148] : memref<2x2x2xf32, #tpu.memory_space<vmem>>, vector<1x2x2xf32>
    %275 = vector.shape_cast %274 : vector<1x2x2xf32> to vector<2x2xf32>
    %276 = vector.broadcast %cst_6 : f32 to vector<2x2xf32>
    %277 = arith.mulf %273, %276 : vector<2x2xf32>
    %278 = arith.addf %275, %277 : vector<2x2xf32>
    %c0_149 = arith.constant 0 : index
    %c0_150 = arith.constant 0 : index
    %c0_151 = arith.constant 0 : index
    %279 = vector.load %arg9[%c0_149, %c0_150, %c0_151] : memref<2x2x2xf32, #tpu.memory_space<vmem>>, vector<1x2x2xf32>
    %280 = vector.shape_cast %279 : vector<1x2x2xf32> to vector<2x2xf32>
    %281 = vector.shape_cast %278 : vector<2x2xf32> to vector<1x2x2xf32>
    tpu.vector_store %arg9[%c0_149, %c0_150, %c0_151], %281 {strides = array<i32>} : memref<2x2x2xf32, #tpu.memory_space<vmem>>, vector<1x2x2xf32>,
    %282 = vector.extract_strided_slice %256 {offsets = [0, 16], sizes = [2, 16], strides = [1, 1]} : vector<2x32xf32> to vector<2x16xf32>
    %283 = vector.extract_strided_slice %259 {offsets = [0, 16], sizes = [2, 16], strides = [1, 1]} : vector<2x32xf32> to vector<2x16xf32>
    %cst_152 = arith.constant dense<0.000000e+00> : vector<2x2xf32>
    %284 = tpu.matmul %282, %283, %cst_152 {dimension_numbers = #tpu.dot_dimension_numbers<[1], [1], [0], [0], [0, 0, 1, 0], [], []>} : vector<2x16xf32>, vector<2x16xf32>, vector<2x2xf32> -> vector<2x2xf32>
    %cst_153 = arith.constant 2.500000e-01 : f32
    %285 = vector.broadcast %cst_153 : f32 to vector<2x2xf32>
    %286 = arith.mulf %284, %285 : vector<2x2xf32>
    %cst_154 = arith.constant dense<0xFF800000> : vector<2xf32>
    %287 = vector.multi_reduction <maximumf>, %286, %cst_154 [1] : vector<2x2xf32> to vector<2xf32>
    %288 = vector.shape_cast %287 : vector<2xf32> to vector<2x1xf32>
    %289 = vector.broadcast %288 : vector<2x1xf32> to vector<2x2xf32>
    %290 = arith.subf %286, %289 : vector<2x2xf32>
    %291 = math.exp %290 : vector<2x2xf32>
    %cst_155 = arith.constant dense<0.000000e+00> : vector<2xf32>
    %292 = vector.multi_reduction <add>, %291, %cst_155 [1] : vector<2x2xf32> to vector<2xf32>
    %293 = vector.shape_cast %292 : vector<2xf32> to vector<2x1xf32>
    %294 = vector.broadcast %293 : vector<2x1xf32> to vector<2x2xf32>
    %295 = arith.divf %291, %294 : vector<2x2xf32>
    %c1_156 = arith.constant 1 : index
    %c0_157 = arith.constant 0 : index
    %c0_158 = arith.constant 0 : index
    %296 = vector.load %arg9[%c1_156, %c0_157, %c0_158] : memref<2x2x2xf32, #tpu.memory_space<vmem>>, vector<1x2x2xf32>
    %297 = vector.shape_cast %296 : vector<1x2x2xf32> to vector<2x2xf32>
    %298 = vector.broadcast %cst_6 : f32 to vector<2x2xf32>
    %299 = arith.mulf %295, %298 : vector<2x2xf32>
    %300 = arith.addf %297, %299 : vector<2x2xf32>
    %c1_159 = arith.constant 1 : index
    %c0_160 = arith.constant 0 : index
    %c0_161 = arith.constant 0 : index
    %301 = vector.load %arg9[%c1_159, %c0_160, %c0_161] : memref<2x2x2xf32, #tpu.memory_space<vmem>>, vector<1x2x2xf32>
    %302 = vector.shape_cast %301 : vector<1x2x2xf32> to vector<2x2xf32>
    %303 = vector.shape_cast %300 : vector<2x2xf32> to vector<1x2x2xf32>
    tpu.vector_store %arg9[%c1_159, %c0_160, %c0_161], %303 {strides = array<i32>} : memref<2x2x2xf32, #tpu.memory_space<vmem>>, vector<1x2x2xf32>,
    %c3_i32 = arith.constant 3 : i32
    %c0_162 = arith.constant 0 : index
    %304 = arith.index_cast %c3_i32 : i32 to index
    %c0_163 = arith.constant 0 : index
    %c0_164 = arith.constant 0 : index
    %305 = vector.load %arg2[%c0_162, %304, %c0_163, %c0_164] : memref<1x4x4x32xf32, #tpu.memory_space<vmem>>, vector<1x1x4x32xf32>
    %306 = vector.shape_cast %305 : vector<1x1x4x32xf32> to vector<4x32xf32>
    %c0_165 = arith.constant 0 : index
    %307 = arith.index_cast %c3_i32 : i32 to index
    %c0_166 = arith.constant 0 : index
    %c0_167 = arith.constant 0 : index
    %308 = vector.load %arg3[%c0_165, %307, %c0_166, %c0_167] : memref<1x4x4x32xf32, #tpu.memory_space<vmem>>, vector<1x1x4x32xf32>
    %309 = vector.shape_cast %308 : vector<1x1x4x32xf32> to vector<4x32xf32>
    %310 = vector.extract_strided_slice %306 {offsets = [0, 0], sizes = [4, 16], strides = [1, 1]} : vector<4x32xf32> to vector<4x16xf32>
    %311 = vector.extract_strided_slice %309 {offsets = [0, 0], sizes = [4, 16], strides = [1, 1]} : vector<4x32xf32> to vector<4x16xf32>
    %cst_168 = arith.constant dense<0.000000e+00> : vector<4x4xf32>
    %312 = tpu.matmul %310, %311, %cst_168 {dimension_numbers = #tpu.dot_dimension_numbers<[1], [1], [0], [0], [0, 0, 1, 0], [], []>} : vector<4x16xf32>, vector<4x16xf32>, vector<4x4xf32> -> vector<4x4xf32>
    %cst_169 = arith.constant 2.500000e-01 : f32
    %313 = vector.broadcast %cst_169 : f32 to vector<4x4xf32>
    %314 = arith.mulf %312, %313 : vector<4x4xf32>
    %cst_170 = arith.constant dense<0xFF800000> : vector<4xf32>
    %315 = vector.multi_reduction <maximumf>, %314, %cst_170 [1] : vector<4x4xf32> to vector<4xf32>
    %316 = vector.shape_cast %315 : vector<4xf32> to vector<4x1xf32>
    %317 = vector.broadcast %316 : vector<4x1xf32> to vector<4x4xf32>
    %318 = arith.subf %314, %317 : vector<4x4xf32>
    %319 = math.exp %318 : vector<4x4xf32>
    %cst_171 = arith.constant dense<0.000000e+00> : vector<4xf32>
    %320 = vector.multi_reduction <add>, %319, %cst_171 [1] : vector<4x4xf32> to vector<4xf32>
    %321 = vector.shape_cast %320 : vector<4xf32> to vector<4x1xf32>
    %322 = vector.broadcast %321 : vector<4x1xf32> to vector<4x4xf32>
    %323 = arith.divf %319, %322 : vector<4x4xf32>
    %c0_172 = arith.constant 0 : index
    %c0_173 = arith.constant 0 : index
    %c0_174 = arith.constant 0 : index
    %324 = vector.load %arg8[%c0_172, %c0_173, %c0_174] : memref<2x4x4xf32, #tpu.memory_space<vmem>>, vector<1x4x4xf32>
    %325 = vector.shape_cast %324 : vector<1x4x4xf32> to vector<4x4xf32>
    %326 = vector.broadcast %cst_6 : f32 to vector<4x4xf32>
    %327 = arith.mulf %323, %326 : vector<4x4xf32>
    %328 = arith.addf %325, %327 : vector<4x4xf32>
    %c0_175 = arith.constant 0 : index
    %c0_176 = arith.constant 0 : index
    %c0_177 = arith.constant 0 : index
    %329 = vector.load %arg8[%c0_175, %c0_176, %c0_177] : memref<2x4x4xf32, #tpu.memory_space<vmem>>, vector<1x4x4xf32>
    %330 = vector.shape_cast %329 : vector<1x4x4xf32> to vector<4x4xf32>
    %331 = vector.shape_cast %328 : vector<4x4xf32> to vector<1x4x4xf32>
    tpu.vector_store %arg8[%c0_175, %c0_176, %c0_177], %331 {strides = array<i32>} : memref<2x4x4xf32, #tpu.memory_space<vmem>>, vector<1x4x4xf32>,
    %332 = vector.extract_strided_slice %306 {offsets = [0, 16], sizes = [4, 16], strides = [1, 1]} : vector<4x32xf32> to vector<4x16xf32>
    %333 = vector.extract_strided_slice %309 {offsets = [0, 16], sizes = [4, 16], strides = [1, 1]} : vector<4x32xf32> to vector<4x16xf32>
    %cst_178 = arith.constant dense<0.000000e+00> : vector<4x4xf32>
    %334 = tpu.matmul %332, %333, %cst_178 {dimension_numbers = #tpu.dot_dimension_numbers<[1], [1], [0], [0], [0, 0, 1, 0], [], []>} : vector<4x16xf32>, vector<4x16xf32>, vector<4x4xf32> -> vector<4x4xf32>
    %cst_179 = arith.constant 2.500000e-01 : f32
    %335 = vector.broadcast %cst_179 : f32 to vector<4x4xf32>
    %336 = arith.mulf %334, %335 : vector<4x4xf32>
    %cst_180 = arith.constant dense<0xFF800000> : vector<4xf32>
    %337 = vector.multi_reduction <maximumf>, %336, %cst_180 [1] : vector<4x4xf32> to vector<4xf32>
    %338 = vector.shape_cast %337 : vector<4xf32> to vector<4x1xf32>
    %339 = vector.broadcast %338 : vector<4x1xf32> to vector<4x4xf32>
    %340 = arith.subf %336, %339 : vector<4x4xf32>
    %341 = math.exp %340 : vector<4x4xf32>
    %cst_181 = arith.constant dense<0.000000e+00> : vector<4xf32>
    %342 = vector.multi_reduction <add>, %341, %cst_181 [1] : vector<4x4xf32> to vector<4xf32>
    %343 = vector.shape_cast %342 : vector<4xf32> to vector<4x1xf32>
    %344 = vector.broadcast %343 : vector<4x1xf32> to vector<4x4xf32>
    %345 = arith.divf %341, %344 : vector<4x4xf32>
    %c1_182 = arith.constant 1 : index
    %c0_183 = arith.constant 0 : index
    %c0_184 = arith.constant 0 : index
    %346 = vector.load %arg8[%c1_182, %c0_183, %c0_184] : memref<2x4x4xf32, #tpu.memory_space<vmem>>, vector<1x4x4xf32>
    %347 = vector.shape_cast %346 : vector<1x4x4xf32> to vector<4x4xf32>
    %348 = vector.broadcast %cst_6 : f32 to vector<4x4xf32>
    %349 = arith.mulf %345, %348 : vector<4x4xf32>
    %350 = arith.addf %347, %349 : vector<4x4xf32>
    %c1_185 = arith.constant 1 : index
    %c0_186 = arith.constant 0 : index
    %c0_187 = arith.constant 0 : index
    %351 = vector.load %arg8[%c1_185, %c0_186, %c0_187] : memref<2x4x4xf32, #tpu.memory_space<vmem>>, vector<1x4x4xf32>
    %352 = vector.shape_cast %351 : vector<1x4x4xf32> to vector<4x4xf32>
    %353 = vector.shape_cast %350 : vector<4x4xf32> to vector<1x4x4xf32>
    tpu.vector_store %arg8[%c1_185, %c0_186, %c0_187], %353 {strides = array<i32>} : memref<2x4x4xf32, #tpu.memory_space<vmem>>, vector<1x4x4xf32>,
    %c0_188 = arith.constant 0 : index
    %354 = arith.index_cast %c3_i32 : i32 to index
    %c0_189 = arith.constant 0 : index
    %c0_190 = arith.constant 0 : index
    %355 = vector.load %arg4[%c0_188, %354, %c0_189, %c0_190] : memref<1x4x2x32xf32, #tpu.memory_space<vmem>>, vector<1x1x2x32xf32>
    %356 = vector.shape_cast %355 : vector<1x1x2x32xf32> to vector<2x32xf32>
    %c0_191 = arith.constant 0 : index
    %357 = arith.index_cast %c3_i32 : i32 to index
    %c0_192 = arith.constant 0 : index
    %c0_193 = arith.constant 0 : index
    %358 = vector.load %arg5[%c0_191, %357, %c0_192, %c0_193] : memref<1x4x2x32xf32, #tpu.memory_space<vmem>>, vector<1x1x2x32xf32>
    %359 = vector.shape_cast %358 : vector<1x1x2x32xf32> to vector<2x32xf32>
    %360 = vector.extract_strided_slice %356 {offsets = [0, 0], sizes = [2, 16], strides = [1, 1]} : vector<2x32xf32> to vector<2x16xf32>
    %361 = vector.extract_strided_slice %359 {offsets = [0, 0], sizes = [2, 16], strides = [1, 1]} : vector<2x32xf32> to vector<2x16xf32>
    %cst_194 = arith.constant dense<0.000000e+00> : vector<2x2xf32>
    %362 = tpu.matmul %360, %361, %cst_194 {dimension_numbers = #tpu.dot_dimension_numbers<[1], [1], [0], [0], [0, 0, 1, 0], [], []>} : vector<2x16xf32>, vector<2x16xf32>, vector<2x2xf32> -> vector<2x2xf32>
    %cst_195 = arith.constant 2.500000e-01 : f32
    %363 = vector.broadcast %cst_195 : f32 to vector<2x2xf32>
    %364 = arith.mulf %362, %363 : vector<2x2xf32>
    %cst_196 = arith.constant dense<0xFF800000> : vector<2xf32>
    %365 = vector.multi_reduction <maximumf>, %364, %cst_196 [1] : vector<2x2xf32> to vector<2xf32>
    %366 = vector.shape_cast %365 : vector<2xf32> to vector<2x1xf32>
    %367 = vector.broadcast %366 : vector<2x1xf32> to vector<2x2xf32>
    %368 = arith.subf %364, %367 : vector<2x2xf32>
    %369 = math.exp %368 : vector<2x2xf32>
    %cst_197 = arith.constant dense<0.000000e+00> : vector<2xf32>
    %370 = vector.multi_reduction <add>, %369, %cst_197 [1] : vector<2x2xf32> to vector<2xf32>
    %371 = vector.shape_cast %370 : vector<2xf32> to vector<2x1xf32>
    %372 = vector.broadcast %371 : vector<2x1xf32> to vector<2x2xf32>
    %373 = arith.divf %369, %372 : vector<2x2xf32>
    %c0_198 = arith.constant 0 : index
    %c0_199 = arith.constant 0 : index
    %c0_200 = arith.constant 0 : index
    %374 = vector.load %arg9[%c0_198, %c0_199, %c0_200] : memref<2x2x2xf32, #tpu.memory_space<vmem>>, vector<1x2x2xf32>
    %375 = vector.shape_cast %374 : vector<1x2x2xf32> to vector<2x2xf32>
    %376 = vector.broadcast %cst_6 : f32 to vector<2x2xf32>
    %377 = arith.mulf %373, %376 : vector<2x2xf32>
    %378 = arith.addf %375, %377 : vector<2x2xf32>
    %c0_201 = arith.constant 0 : index
    %c0_202 = arith.constant 0 : index
    %c0_203 = arith.constant 0 : index
    %379 = vector.load %arg9[%c0_201, %c0_202, %c0_203] : memref<2x2x2xf32, #tpu.memory_space<vmem>>, vector<1x2x2xf32>
    %380 = vector.shape_cast %379 : vector<1x2x2xf32> to vector<2x2xf32>
    %381 = vector.shape_cast %378 : vector<2x2xf32> to vector<1x2x2xf32>
    tpu.vector_store %arg9[%c0_201, %c0_202, %c0_203], %381 {strides = array<i32>} : memref<2x2x2xf32, #tpu.memory_space<vmem>>, vector<1x2x2xf32>,
    %382 = vector.extract_strided_slice %356 {offsets = [0, 16], sizes = [2, 16], strides = [1, 1]} : vector<2x32xf32> to vector<2x16xf32>
    %383 = vector.extract_strided_slice %359 {offsets = [0, 16], sizes = [2, 16], strides = [1, 1]} : vector<2x32xf32> to vector<2x16xf32>
    %cst_204 = arith.constant dense<0.000000e+00> : vector<2x2xf32>
    %384 = tpu.matmul %382, %383, %cst_204 {dimension_numbers = #tpu.dot_dimension_numbers<[1], [1], [0], [0], [0, 0, 1, 0], [], []>} : vector<2x16xf32>, vector<2x16xf32>, vector<2x2xf32> -> vector<2x2xf32>
    %cst_205 = arith.constant 2.500000e-01 : f32
    %385 = vector.broadcast %cst_205 : f32 to vector<2x2xf32>
    %386 = arith.mulf %384, %385 : vector<2x2xf32>
    %cst_206 = arith.constant dense<0xFF800000> : vector<2xf32>
    %387 = vector.multi_reduction <maximumf>, %386, %cst_206 [1] : vector<2x2xf32> to vector<2xf32>
    %388 = vector.shape_cast %387 : vector<2xf32> to vector<2x1xf32>
    %389 = vector.broadcast %388 : vector<2x1xf32> to vector<2x2xf32>
    %390 = arith.subf %386, %389 : vector<2x2xf32>
    %391 = math.exp %390 : vector<2x2xf32>
    %cst_207 = arith.constant dense<0.000000e+00> : vector<2xf32>
    %392 = vector.multi_reduction <add>, %391, %cst_207 [1] : vector<2x2xf32> to vector<2xf32>
    %393 = vector.shape_cast %392 : vector<2xf32> to vector<2x1xf32>
    %394 = vector.broadcast %393 : vector<2x1xf32> to vector<2x2xf32>
    %395 = arith.divf %391, %394 : vector<2x2xf32>
    %c1_208 = arith.constant 1 : index
    %c0_209 = arith.constant 0 : index
    %c0_210 = arith.constant 0 : index
    %396 = vector.load %arg9[%c1_208, %c0_209, %c0_210] : memref<2x2x2xf32, #tpu.memory_space<vmem>>, vector<1x2x2xf32>
    %397 = vector.shape_cast %396 : vector<1x2x2xf32> to vector<2x2xf32>
    %398 = vector.broadcast %cst_6 : f32 to vector<2x2xf32>
    %399 = arith.mulf %395, %398 : vector<2x2xf32>
    %400 = arith.addf %397, %399 : vector<2x2xf32>
    %c1_211 = arith.constant 1 : index
    %c0_212 = arith.constant 0 : index
    %c0_213 = arith.constant 0 : index
    %401 = vector.load %arg9[%c1_211, %c0_212, %c0_213] : memref<2x2x2xf32, #tpu.memory_space<vmem>>, vector<1x2x2xf32>
    %402 = vector.shape_cast %401 : vector<1x2x2xf32> to vector<2x2xf32>
    %403 = vector.shape_cast %400 : vector<2x2xf32> to vector<1x2x2xf32>
    tpu.vector_store %arg9[%c1_211, %c0_212, %c0_213], %403 {strides = array<i32>} : memref<2x2x2xf32, #tpu.memory_space<vmem>>, vector<1x2x2xf32>,
    %c4_i32 = arith.constant 4 : i32
    %c0_214 = arith.constant 0 : index
    %c0_215 = arith.constant 0 : index
    %c0_216 = arith.constant 0 : index
    %404 = vector.load %arg8[%c0_214, %c0_215, %c0_216] : memref<2x4x4xf32, #tpu.memory_space<vmem>>, vector<2x4x4xf32>
    %c0_217 = arith.constant 0 : index
    %c0_218 = arith.constant 0 : index
    %c0_219 = arith.constant 0 : index
    %c0_220 = arith.constant 0 : index
    %405 = vector.load %arg6[%c0_217, %c0_218, %c0_219, %c0_220] : memref<1x2x4x4xf32, #tpu.memory_space<vmem>>, vector<1x2x4x4xf32>
    %406 = vector.shape_cast %405 : vector<1x2x4x4xf32> to vector<2x4x4xf32>
    %407 = vector.shape_cast %404 : vector<2x4x4xf32> to vector<1x2x4x4xf32>
    tpu.vector_store %arg6[%c0_217, %c0_218, %c0_219, %c0_220], %407 {strides = array<i32>} : memref<1x2x4x4xf32, #tpu.memory_space<vmem>>, vector<1x2x4x4xf32>,
    %c0_221 = arith.constant 0 : index
    %c0_222 = arith.constant 0 : index
    %c0_223 = arith.constant 0 : index
    %408 = vector.load %arg9[%c0_221, %c0_222, %c0_223] : memref<2x2x2xf32, #tpu.memory_space<vmem>>, vector<2x2x2xf32>
    %c0_224 = arith.constant 0 : index
    %c0_225 = arith.constant 0 : index
    %c0_226 = arith.constant 0 : index
    %c0_227 = arith.constant 0 : index
    %409 = vector.load %arg7[%c0_224, %c0_225, %c0_226, %c0_227] : memref<1x2x2x2xf32, #tpu.memory_space<vmem>>, vector<1x2x2x2xf32>
    %410 = vector.shape_cast %409 : vector<1x2x2x2xf32> to vector<2x2x2xf32>
    %411 = vector.shape_cast %408 : vector<2x2x2xf32> to vector<1x2x2x2xf32>
    tpu.vector_store %arg7[%c0_224, %c0_225, %c0_226, %c0_227], %411 {strides = array<i32>} : memref<1x2x2x2xf32, #tpu.memory_space<vmem>>, vector<1x2x2x2xf32>,
    return
  }
  func.func @transform_0(%arg0: i32, %arg1: i32) -> (i32, i32, i32, i32) {
    %c0_i32 = arith.constant 0 : i32
    %c0_i32_0 = arith.constant 0 : i32
    %c0_i32_1 = arith.constant 0 : i32
    return %arg0, %c0_i32, %c0_i32_0, %arg1 : i32, i32, i32, i32
  }
  func.func @transform_1(%arg0: i32, %arg1: i32) -> (i32, i32, i32, i32) {
    %c0_i32 = arith.constant 0 : i32
    %c0_i32_0 = arith.constant 0 : i32
    %c0_i32_1 = arith.constant 0 : i32
    return %arg0, %c0_i32, %c0_i32_0, %arg1 : i32, i32, i32, i32
  }
  func.func @transform_2(%arg0: i32, %arg1: i32) -> (i32, i32, i32, i32) {
    %c0_i32 = arith.constant 0 : i32
    %c0_i32_0 = arith.constant 0 : i32
    %c0_i32_1 = arith.constant 0 : i32
    return %arg0, %c0_i32, %c0_i32_0, %arg1 : i32, i32, i32, i32
  }
  func.func @transform_3(%arg0: i32, %arg1: i32) -> (i32, i32, i32, i32) {
    %c0_i32 = arith.constant 0 : i32
    %c0_i32_0 = arith.constant 0 : i32
    %c0_i32_1 = arith.constant 0 : i32
    return %arg0, %c0_i32, %c0_i32_0, %arg1 : i32, i32, i32, i32
  }
  func.func @transform_4(%arg0: i32, %arg1: i32) -> (i32, i32, i32, i32) {
    %c0_i32 = arith.constant 0 : i32
    %c0_i32_0 = arith.constant 0 : i32
    %c0_i32_1 = arith.constant 0 : i32
    return %arg0, %arg1, %c0_i32, %c0_i32_0 : i32, i32, i32, i32
  }
  func.func @transform_5(%arg0: i32, %arg1: i32) -> (i32, i32, i32, i32) {
    %c0_i32 = arith.constant 0 : i32
    %c0_i32_0 = arith.constant 0 : i32
    %c0_i32_1 = arith.constant 0 : i32
    return %arg0, %arg1, %c0_i32, %c0_i32_0 : i32, i32, i32, i32
  }
}

</mosaic_0001>

<bundles_post_ra>
// kernel: tpu_custom_call.1
= control target key start
LH: loop header
LB: loop body
LE: loop exit
PB: predicated region body
PF: predicated region fallthrough
CT: control target
= control target key end

     0   :  { %s2650_s0 = inlined_call_operand.hbm [shape: f32[2,4,4,32], index: 0, kind: input, shape index: {}]   ;;  %s2651_s1 = inlined_call_operand.hbm [shape: f32[2,4,4,32], index: 1, kind: input, shape index: {}]   ;;  %s2652_s2 = inlined_call_operand.hbm [shape: f32[2,4,2,32], index: 2, kind: input, shape index: {}]   ;;  %s2653_s3 = inlined_call_operand.hbm [shape: f32[2,4,2,32], index: 3, kind: input, shape index: {}]   ;;  %s2654_s4 = inlined_call_operand.hbm [shape: f32[2,2,4,4], index: 4, kind: output, shape index: {0}]   ;;  %s2655_s5 = inlined_call_operand.hbm [shape: f32[2,2,2,2], index: 5, kind: output, shape index: {1}]  }
   0x1   :  { %2662 = sst [smem:[#allocation26_spill]] %s2650_s0 }
   0x2   :  { %2663 = sst [smem:[#allocation27_spill]] %s2651_s1 }
   0x3   :  { %11 = vsyncpa [#allocation5], 0 }
   0x4   :  { %13 = vsyncpa [#allocation5 + $0x1], 0 }
   0x5   :  { %14 = vsyncpa [#allocation8], 0 }
   0x6   :  { %16 = vsyncpa [#allocation8 + $0x1], 0 }
   0x7   :  { %17 = vsyncpa [#allocation11], 0 }
   0x8   :  { %19 = vsyncpa [#allocation11 + $0x1], 0 }
   0x9   :  { %20 = vsyncpa [#allocation6], 0 }
   0xa   :  { %22 = vsyncpa [#allocation6 + $0x1], 0 }
   0xb   :  { %23 = vsyncpa [#allocation14], 0 }
   0xc   :  { %25 = vsyncpa [#allocation14 + $0x1], 0  ;;  %s2107_s18 = smov 0   ;;  %s2109_s19 = smov 0  }
   0xd   :  { %s2111_s20 = smov 0   ;;  %s2113_s21 = smov 0  }
   0xe   :  { %s2115_s22 = smov 0   ;;  %s2117_s23 = smov 0  }
   0xf LB: > { %2664 = sst [smem:[#allocation20_spill]] %s2045_s18  ;;  %s2138_s24 = sadd.s32 4294967295, %s2065_s23   ;;  %s2065_s23 = sphi %s2117_s23, %s31_s23   ;;  %s2061_s22 = sphi %s2115_s22, %s2695_s22   ;;  %s2057_s21 = sphi %s2113_s21, %s2694_s21   ;;  %s2053_s20 = sphi %s2111_s20, %s2690_s20   ;;  %s2049_s19 = sphi %s2109_s19, %s2693_s19   ;;  %s2045_s18 = sphi %s2107_s18, %s2692_s18  }
  0x10   : > { %2665 = sst [smem:[#allocation21_spill]] %s2053_s20  ;;  %s1587_s25 = sadd.s32 4294967294, %s2065_s23  }
  0x11   : > { %2666 = sst [smem:[#allocation22_spill]] %s2065_s23  ;;  %s43_s26 = sadd.s32 1, %s2061_s22 }
  0x12   : > { %s52_s27 = sadd.s32 1, %s2053_s20  ;;  %p45_p0 = scmp.ge.s32.totalorder %s43_s26, 2 }
  0x13   : > { %p59_p1 = scmp.ne.s32.totalorder %s2053_s20, %s2049_s19  ;;  %p60_p2 = scmp.eq.s32.totalorder %s2065_s23, 0 }
  0x14   : > { %p65_p3 = scmp.ne.s32.totalorder %s2049_s19, %s2045_s18  ;;  %s2697_s26 = smov (%p45_p0, %s43_s26), 0 }
  0x15   : > { %2667 = sst [smem:[#allocation23_spill]] %s2697_s26  ;;  %p2150_p4 = por %p60_p2, %p59_p1 }
  0x16   : > { %p66_p5 = scmp.eq.s32.totalorder %s2138_s24, 0  ;;  %s47_s29 = ssub.s32 %s2061_s22, %s2697_s26 }
  0x17   : > { %p175_p6 = scmp.eq.s32.totalorder %s2138_s24, 1  ;;  %p50_p7 = scmp.eq.s32.totalorder %s47_s29, 0 }
  0x18   : > { %p2158_p8 = por %p66_p5, %p65_p3  ;;  %p181_p10 = scmp.eq.s32.totalorder %s1587_s25, 1 }
  0x19   : > { %p2162_p9 = por %p175_p6, %p59_p1  ;;  %p1589_p12 = scmp.ge.s32.totalorder %s2065_s23, 2 }
  0x1a   : > { %s2167_s7 = scalar_select %p50_p7, %s2053_s20, %s52_s27  }
  0x1b   : > { %p2169_p11 = por %p181_p10, %p65_p3  ;;  %p1699_p13 = scmp.lt.s32.totalorder %s2065_s23, 2 }
  0x1c   : > { %2671 = sst [smem:[#allocation24_spill]] %s2167_s7  ;;  %s2176_s9 = sand.u32 1, %s2053_s20  }
  0x1d   : > { %s2672_s8 = scalar_select %p2169_p11, 1, 0 }
  0x1e   : > { %s1590_s10 = sshll.u32 %s2176_s9, 4  ;;  %s1661_s11 = sshll.u32 %s2061_s22, 4 }
  0x1f   : > { %2673 = sst [smem:[#allocation25_spill]] %s2672_s8  ;;  %p2182_p0 = pnand %p1699_p13, %p2150_p4 }
  0x20   : > { %s252_s13 = sand.u32 1, %s2065_s23   ;;  %s2675_s1 = sld [smem:[#allocation27_spill]] }
  0x21   : > { %s256_s25 = scalar_lea.vmem [#allocation7], %s1590_s10  ;;  %s2190_s29 = scalar_lea.sflag [#allocation8], %s252_s13 }
  0x22   : > { %s265_s27 = sshll.u32 %s256_s25, 4  ;;  %s2067_s28 = smov 64   ;;  %s266_s27 = int_to_ptr.vmem [resolvable:$true] %s265_s27 }
  0x23   : > { %s2068_s26 = smov 4   ;;  %p1602_p1 = scmp.ge.s32.totalorder %s2065_s23, 1 }
  0x24   : > { %p319_p2 = scmp.lt.s32.totalorder %s2065_s23, 3  ;;  %s2677_s0 = sld [smem:[#allocation26_spill]] }
  0x25   : > { %s233_s7 = scalar_lea.vmem [#allocation4], %s1590_s10  ;;  %s230_s20 = scalar_lea.sflag [#allocation5], %s2176_s9 }
  0x26   : > { %s262_s16 = scalar_lea.hbm %s2675_s1, %s1661_s11  ;;  %p2197_p3 = pnand %p1602_p1, %p319_p2 }
  0x27   : > { %s263_s17 = sshll.u32 %s262_s16, 4  ;;  %s242_s13 = sshll.u32 %s233_s7, 4  ;;  %s264_s17 = int_to_ptr.hbm [resolvable:$true] %s263_s17  ;;  %s243_s13 = int_to_ptr.vmem [resolvable:$true] %s242_s13 }
  0x28   : > { %1685 = dma.hbm_to_vmem [thread:$0]  (!%p2182_p0), %s264_s17, 256, %s266_s27, %s2190_s29, %s2067_s28, %s2067_s28, %s2068_s26  }
  0x29   : > { %s1596_s17 = sshll.u32 %s2176_s9, 3  ;;  %s1663_s27 = sshll.u32 %s2061_s22, 3 }
  0x2a   : > { %s239_s25 = scalar_lea.hbm %s2677_s0, %s1661_s11  ;;  %s285_s18 = scalar_lea.hbm %s2652_s2, %s1663_s27 }
  0x2b   : > { %s240_s1 = sshll.u32 %s239_s25, 4  ;;  %s286_s15 = sshll.u32 %s285_s18, 4  ;;  %s241_s1 = int_to_ptr.hbm [resolvable:$true] %s240_s1  ;;  %s287_s15 = int_to_ptr.hbm [resolvable:$true] %s286_s15 }
  0x2c   : > { %1682 = dma.hbm_to_vmem [thread:$0]  (!%p2182_p0), %s241_s1, 256, %s243_s13, %s230_s20, %s2067_s28, %s2067_s28, %s2068_s26  }
  0x2d   : > { %s279_s11 = scalar_lea.vmem [#allocation9], %s1596_s17  ;;  %s2069_s10 = smov 32  }
  0x2e   : > { %s288_s16 = sshll.u32 %s279_s11, 4  ;;  %s2070_s7 = smov 2   ;;  %s289_s16 = int_to_ptr.vmem [resolvable:$true] %s288_s16 }
  0x2f   : > { %1688 = dma.hbm_to_vmem [thread:$0]  (!%p2182_p0), %s287_s15, 128, %s289_s16, %s2190_s29, %s2069_s10, %s2069_s10, %s2070_s7  }
  0x30   : > { %s308_s1 = scalar_lea.hbm %s2653_s3, %s1663_s27  ;;  %s302_s20 = scalar_lea.vmem [#allocation10], %s1596_s17 }
  0x31   : > { %s311_s26 = sshll.u32 %s302_s20, 4  ;;  %s309_s28 = sshll.u32 %s308_s1, 4  ;;  %s312_s26 = int_to_ptr.vmem [resolvable:$true] %s311_s26  ;;  %s310_s28 = int_to_ptr.hbm [resolvable:$true] %s309_s28 }
  0x32   : > { %s299_s23 = scalar_lea.sflag [#allocation11], %s2176_s9  ;;  %323 = sbr.rel (%p2197_p3) target bundleno = 765 (0x2fd), region = 36 }
  0x33   : > { %1691 = dma.hbm_to_vmem [thread:$0]  (!%p2182_p0), %s310_s28, 128, %s312_s26, %s299_s23, %s2069_s10, %s2069_s10, %s2070_s7  }
  0x34   : > { %s2224_s18 = sand.u32 (!%p2197_p3), 1, %s2049_s19  }
  0x35   : > { %s1603_s8 = sshll.u32 (!%p2197_p3), %s2224_s18, 4  ;;  %s326_s0 = scalar_lea.sflag (!%p2197_p3), [#allocation5], %s2224_s18 }
  0x36   : > { %s2228_s29 = scalar_lea.vmem (!%p2197_p3), [#allocation4], %s1603_s8 }
  0x37   : > { %2024 = dma.done.wait (%p2158_p8), %s326_s0, 256  }
  0x38   : > { %2026 = vsyncadd (%p2158_p8), %s326_s0, 4294967040  ;;  %s335_s9 = sand.u32 1, %s2138_s24   ;;  %s2235_s14 = scalar_lea.vmem [#allocation7], %s1603_s8 }
  0x39   : > { %s336_s12 = scalar_lea.sflag [#allocation8], %s335_s9 }
  0x3a   : > { %2028 = dma.done.wait (%p2158_p8), %s336_s12, 384  }
  0x3b   : > { %2030 = vsyncadd (%p2158_p8), %s336_s12, 4294966912  ;;  %s2242_s13 = sshll.u32 %s2224_s18, 3  ;;  %s356_s27 = scalar_lea.sflag [#allocation11], %s2224_s18 }
  0x3c   : > { %s2245_s17 = scalar_lea.vmem [#allocation9], %s2242_s13  ;;  %s2249_s15 = scalar_lea.vmem [#allocation10], %s2242_s13 }
  0x3d   : > { %2032 = dma.done.wait (%p2158_p8), %s356_s27, 128  }
  0x3e   : > { %2034 = vsyncadd (%p2158_p8), %s356_s27, 4294967168  ;;  %vm417_vm0 = vcmask 130048   ;;  %v532_v0 = vld [vmem:[%s2249_s15] sm:$0x3]  ;;  %v416_v1 = vld [vmem:[%s2235_s14] sm:$0xf] }
  0x3f   : > { %s2071_s24 = smov 112   ;;  %1613 = vmatpush.xpose.msk.msra.mxu2 %vm417_vm0, %v532_v0  ;;  %v531_v2 = vld [vmem:[%s2245_s17] sm:$0x3]  ;;  %v1624_v3 = vld [vmem:[%s2249_s15 + $0x2] sm:$0x3]  ;;  %1609 = vmatpush.xpose.msk.msra.mxu0 %vm417_vm0, %v416_v1  ;;  %vm409_vm1 = vcmask 27648  }
  0x40   : > { %590 = vrot.lane.b32.xlu0 %v532_v0, %s2071_s24  ;;  %v1618_v4 = vld [vmem:[%s2235_s14 + $0x4] sm:$0xf]  ;;  %475 = vrot.lane.b32.xlu1 %v416_v1, %s2071_s24  ;;  %v415_v5 = vld [vmem:[%s2228_s29] sm:$0xf]  ;;  %vm412_vm2 = vcmask 9216   ;;  %s2503_s30 = scalar_lea.vmem [#allocation12], %s2242_s13 }
  0x41   : > { %v1636_v6 = vld [vmem:[%s2249_s15 + $0x4] sm:$0x3]  ;;  %v1630_v7 = vld [vmem:[%s2235_s14 + $0x8] sm:$0xf]  ;;  %823 = vrot.lane.b32.xlu2 %v1624_v3, %s2071_s24  ;;  %v1623_v8 = vld [vmem:[%s2245_s17 + $0x2] sm:$0x3] }
  0x42   : > { %1614 = vmatmul.msk.f32.vlgmr.msra.gmra.mxu2 %vm417_vm0, %v531_v2  ;;  %1610 = vmatmul.msk.f32.vlgmr.msra.gmra.mxu0 %vm417_vm0, %v415_v5  ;;  %v1617_v9 = vld [vmem:[%s2228_s29 + $0x4] sm:$0xf]  ;;  %v1642_v10 = vld [vmem:[%s2235_s14 + $0xc] sm:$0xf]  ;;  %v1629_v13 = vld [vmem:[%s2228_s29 + $0x8] sm:$0xf] }
  0x43   : > { %1625 = vmatpush.xpose.msk.msrb.mxu2 %vm417_vm0, %v1624_v3  ;;  %1619 = vmatpush.xpose.msk.msrb.mxu0 %vm417_vm0, %v1618_v4  ;;  %v1648_v11 = vld [vmem:[%s2249_s15 + $0x6] sm:$0x3]  ;;  %v1635_v12 = vld [vmem:[%s2245_s17 + $0x4] sm:$0x3]  ;;  %v1647_v15 = vld [vmem:[%s2245_s17 + $0x6] sm:$0x3] }
  0x44   : > { %v1641_v14 = vld [vmem:[%s2228_s29 + $0xc] sm:$0xf]  ;;  %s1666_s11 = sshll.u32 %s2057_s21, 2  ;;  %s1665_s16 = sshll.u32 %s2057_s21, 3 }
  0x45   : > { %s1608_s10 = sshll.u32 %s2224_s18, 2  ;;  %s1388_s1 = scalar_lea.hbm %s2655_s5, %s1666_s11 }
  0x46   : > { %s1369_s28 = scalar_lea.hbm %s2654_s4, %s1665_s16  ;;  %s406_s23 = scalar_lea.vmem [#allocation13], %s1608_s10 }
  0x47   : > { %1637 = vmatpush.xpose.msk.msra.mxu2 %vm417_vm0, %v1636_v6  ;;  %1631 = vmatpush.xpose.msk.msra.mxu0 %vm417_vm0, %v1630_v7  ;;  %s1389_s21 = sshll.u32 %s406_s23, 4  ;;  %s1370_s8 = sshll.u32 %s2503_s30, 4  ;;  %s1390_s21 = int_to_ptr.vmem [resolvable:$true] %s1389_s21  ;;  %s2594_s8 = int_to_ptr.vmem [resolvable:$true] %s1370_s8 }
  0x48   : > { %588 = vrot.lane.b32.xlu0 %v531_v2, %s2071_s24  ;;  %473 = vrot.lane.b32.xlu1 %v415_v5, %s2071_s24  ;;  %s1391_s0 = sshll.u32 %s1388_s1, 4  ;;  %s1372_s29 = sshll.u32 %s1369_s28, 4  ;;  %s1392_s0 = int_to_ptr.hbm [resolvable:$true] %s1391_s0  ;;  %s2596_s29 = int_to_ptr.hbm [resolvable:$true] %s1372_s29 }
  0x49   : > { %821 = vrot.lane.b32.xlu2 %v1623_v8, %s2071_s24  ;;  %s1356_s9 = scalar_lea.sflag [#allocation14], %s2224_s18  ;;  %s1957_s12 = sshra.s32 %s1392_s0, 4  ;;  %s1958_s12 = int_to_ptr.hbm [resolvable:$true] %s1957_s12 }
  0x4a   : > { %1626 = vmatmul.msk.f32.vlgmr.msrb.gmra.mxu2 %vm417_vm0, %v1623_v8  ;;  %1620 = vmatmul.msk.f32.vlgmr.msrb.gmra.mxu0 %vm417_vm0, %v1617_v9  ;;  %s1959_s14 = scalar_lea.hbm %s1958_s12, 4  ;;  %s1963_s27 = scalar_lea.hbm %s2655_s5, 8 }
  0x4b   : > { %1649 = vmatpush.xpose.msk.msrb.mxu2 %vm417_vm0, %v1648_v11  ;;  %1643 = vmatpush.xpose.msk.msrb.mxu0 %vm417_vm0, %v1642_v10  ;;  %p1960_p4 = scmp.ne.s32.totalorder %s1958_s12, %s1959_s14  ;;  %p1964_p7 = scmp.lt.s32.totalorder %s1958_s12, %s2655_s5 }
  0x4c   : > { %p1965_p8 = scmp.lt.s32.totalorder %s1963_s27, %s1959_s14 }
  0x4d   : > { %p1961_p5 = pnand %p1960_p4, %p2162_p9 }
  0x4e   : > { %p1966_p10 = por %p1965_p8, %p1964_p7 }
  0x4f   : > { %p1962_p6 = pneg %p1961_p5 }
  0x50   : > { %707 = vrot.lane.b32.xlu0 %v1618_v4, %s2071_s24  ;;  %705 = vrot.lane.b32.xlu1 %v1617_v9, %s2071_s24 }
  0x51   : > { %1055 = vrot.lane.b32.xlu2 %v1636_v6, %s2071_s24  ;;  %p1967_p13 = pnand %p1966_p10, %p1962_p6 }
  0x52   : > { %1638 = vmatmul.msk.f32.vlgmr.msra.gmra.mxu2 %vm417_vm0, %v1635_v12  ;;  %1632 = vmatmul.msk.f32.vlgmr.msra.gmra.mxu0 %vm417_vm0, %v1629_v13 }
  0x58   : > { %1053 = vrot.lane.b32.xlu0 %v1635_v12, %s2071_s24  ;;  %939 = vrot.lane.b32.xlu1 %v1630_v7, %s2071_s24 }
  0x59   : > { %937 = vrot.lane.b32.xlu2 %v1629_v13, %s2071_s24 }
  0x5a   : > { %1650 = vmatmul.msk.f32.vlgmr.msrb.gmra.mxu2 %vm417_vm0, %v1647_v15  ;;  %1644 = vmatmul.msk.f32.vlgmr.msrb.gmra.mxu0 %vm417_vm0, %v1641_v14 }
  0x60   : > { %1287 = vrot.lane.b32.xlu0 %v1648_v11, %s2071_s24  ;;  %1285 = vrot.lane.b32.xlu1 %v1647_v15, %s2071_s24 }
  0x61   : > { %1171 = vrot.lane.b32.xlu2 %v1642_v10, %s2071_s24 }
  0x68   : > { %1169 = vrot.lane.b32.xlu0 %v1641_v14, %s2071_s24 }
  0x9b   : > { %v824_v16 = vpop.permute.xlu2 %823 }
  0xa3   : > { %v822_v17 = vpop.permute.xlu2 %821 }
  0xab   : > { %v1056_v22 = vpop.permute.xlu2 %1055 }
  0xb2   : > { %v591_v18 = vpop.permute.xlu0 %590  ;;  %v476_v19 = vpop.permute.xlu1 %475 }
  0xb3   : > { %1615 = vmatpush.xpose.msk.msra.mxu3 %vm417_vm0, %v591_v18  ;;  %1611 = vmatpush.xpose.msk.msra.mxu1 %vm417_vm0, %v476_v19  ;;  %v938_v28 = vpop.permute.xlu2 %937 }
  0xb7   : > { %1627 = vmatpush.xpose.msk.msrb.mxu3 %vm417_vm0, %v824_v16 }
  0xba   : > { %v589_v20 = vpop.permute.xlu0 %588  ;;  %v474_v21 = vpop.permute.xlu1 %473 }
  0xbb   : > { %1616 = vmatmul.msk.f32.vlgmr.msra.gmra.mxu3 %vm417_vm0, %v589_v20  ;;  %1612 = vmatmul.msk.f32.vlgmr.msra.gmra.mxu1 %vm417_vm0, %v474_v21  ;;  %v1172_v37 = vpop.permute.xlu2 %1171 }
  0xbc   : > { %1639 = vmatpush.xpose.msk.msra.mxu3 %vm417_vm0, %v1056_v22 }
  0xbf   : > { %v441_v23 = vpop.f32.mrf.mxu0 }
  0xc0   : > { %v444_v24 = vmul.f32 0.25, %v441_v23 }
  0xc2   : > { %v708_v25 = vpop.permute.xlu0 %707  ;;  %v706_v26 = vpop.permute.xlu1 %705  ;;  %v445_v27 = vsel %vm409_vm1, %v444_v24, -inf }
  0xc3   : > { %1621 = vmatpush.xpose.msk.msrb.mxu1 %vm417_vm0, %v708_v25  ;;  %1628 = vmatmul.msk.f32.vlgmr.msrb.gmra.mxu3 %vm417_vm0, %v822_v17 }
  0xc4   : > { %446 = vmax.xlane.f32.xlu1 %v445_v27 }
  0xc5   : > { %v556_v29 = vpop.f32.mrf.mxu2 }
  0xc6   : > { %1622 = vmatmul.msk.f32.vlgmr.msrb.gmra.mxu1 %vm417_vm0, %v706_v26  ;;  %v559_v30 = vmul.f32 0.25, %v556_v29 }
  0xc7   : > { %v673_v31 = vpop.f32.mrf.mxu0 }
  0xc8   : > { %v2313_v32 = vmul.f32 0.25, %v673_v31  ;;  %v560_v34 = vsel %vm412_vm2, %v559_v30, -inf }
  0xca   : > { %v1054_v33 = vpop.permute.xlu0 %1053  ;;  %v940_v35 = vpop.permute.xlu1 %939  ;;  %v677_v36 = vsel %vm409_vm1, %v2313_v32, -inf }
  0xcb   : > { %1640 = vmatmul.msk.f32.vlgmr.msra.gmra.mxu3 %vm417_vm0, %v1054_v33  ;;  %1633 = vmatpush.xpose.msk.msra.mxu1 %vm417_vm0, %v940_v35 }
  0xcc   : > { %678 = vmax.xlane.f32.xlu2 %v677_v36  ;;  %561 = vmax.xlane.f32.xlu1 %v560_v34 }
  0xcd   : > { %v789_v38 = vpop.f32.mrf.mxu2 }
  0xce   : > { %v792_v39 = vmul.f32 0.25, %v789_v38  ;;  %1634 = vmatmul.msk.f32.vlgmr.msra.gmra.mxu1 %vm417_vm0, %v938_v28 }
  0xcf   : > { %1645 = vmatpush.xpose.msk.msrb.mxu1 %vm417_vm0, %v1172_v37  ;;  %v905_v40 = vpop.f32.mrf.mxu0 }
  0xd0   : > { %v793_v41 = vsel %vm412_vm2, %v792_v39, -inf  ;;  %v908_v42 = vmul.f32 0.25, %v905_v40 }
  0xd1   : > { %794 = vmax.xlane.f32.xlu0 %v793_v41 }
  0xd2   : > { %v1288_v43 = vpop.permute.xlu0 %1287  ;;  %v1286_v44 = vpop.permute.xlu1 %1285  ;;  %v909_v45 = vsel %vm409_vm1, %v908_v42, -inf }
  0xd3   : > { %1651 = vmatpush.xpose.msk.msrb.mxu3 %vm417_vm0, %v1288_v43 }
  0xd4   : > { %910 = vmax.xlane.f32.xlu1 %v909_v45 }
  0xd5   : > { %v1021_v46 = vpop.f32.mrf.mxu2 }
  0xd6   : > { %1652 = vmatmul.msk.f32.vlgmr.msrb.gmra.mxu3 %vm417_vm0, %v1286_v44  ;;  %v1024_v47 = vmul.f32 0.25, %v1021_v46 }
  0xd7   : > { %v1137_v48 = vpop.f32.mrf.mxu0 }
  0xd8   : > { %v1025_v49 = vsel %vm412_vm2, %v1024_v47, -inf  ;;  %v1140_v50 = vmul.f32 0.25, %v1137_v48 }
  0xd9   : > { %1026 = vmax.xlane.f32.xlu2 %v1025_v49 }
  0xda   : > { %v1141_v51 = vsel %vm409_vm1, %v1140_v50, -inf  ;;  %v1170_v52 = vpop.permute.xlu0 %1169 }
  0xdb   : > { %1142 = vmax.xlane.f32.xlu0 %v1141_v51  ;;  %1646 = vmatmul.msk.f32.vlgmr.msrb.gmra.mxu1 %vm417_vm0, %v1170_v52 }
 0x137   : > { %v447_v53 = vpop.xlane.xlu1 %446 }
 0x138   : > { %v448_v54 = vsub.f32 %v444_v24, %v447_v53  ;;  %v498_v55 = vpop.f32.mrf.mxu1 }
 0x139   : > { %v2329_v56 = vmul.f32 0.25, %v498_v55 }
 0x13a   : > { %v449_v57 = vmul.f32 1.442695, %v448_v54 }
 0x13b   : > { %v502_v58 = vsel %vm409_vm1, %v2329_v56, -inf }
 0x13c   : > { %1759 = vpow2.f32 %v449_v57  ;;  %503 = vmax.xlane.f32.xlu0 %v502_v58 }
 0x13e   : > { %v613_v59 = vpop.f32.mrf.mxu3 }
 0x13f   : > { %v2333_v60 = vmul.f32 0.25, %v613_v59  ;;  %v562_v61 = vpop.xlane.xlu1 %561  ;;  %v679_v63 = vpop.xlane.xlu2 %678 }
 0x140   : > { %v563_v0 = vsub.f32 %v559_v30, %v562_v61  ;;  %v680_v6 = vsub.f32 %v2313_v32, %v679_v63 }
 0x141   : > { %v617_v3 = vsel %vm412_vm2, %v2333_v60, -inf }
 0x142   : > { %v2335_v62 = vpop.eup %1759  ;;  %v564_v9 = vmul.f32 1.442695, %v563_v0  ;;  %v681_v13 = vmul.f32 1.442695, %v680_v6 }
 0x143   : > { %v730_v1 = vpop.f32.mrf.mxu1  ;;  %v451_v4 = vsel %vm409_vm1, %v2335_v62, 0.0 }
 0x144   : > { %v2337_v2 = vmul.f32 0.25, %v730_v1  ;;  %618 = vmax.xlane.f32.xlu0 %v617_v3  ;;  %452 = vadd.xlane.f32.xlu2 %v451_v4  ;;  %v795_v5 = vpop.xlane.xlu0 %794  ;;  %1761 = vpow2.f32 %v564_v9 }
 0x145   : > { %v796_v10 = vsub.f32 %v792_v39, %v795_v5  ;;  %1763 = vpow2.f32 %v681_v13 }
 0x146   : > { %v846_v7 = vpop.f32.mrf.mxu3  ;;  %v734_v8 = vsel %vm409_vm1, %v2337_v2, -inf }
 0x147   : > { %735 = vmax.xlane.f32.xlu1 %v734_v8  ;;  %v2346_v11 = vmul.f32 0.25, %v846_v7  ;;  %v911_v12 = vpop.xlane.xlu1 %910  ;;  %v797_v15 = vmul.f32 1.442695, %v796_v10 }
 0x148   : > { %v912_v14 = vsub.f32 %v908_v42, %v911_v12  ;;  %v2072_v42 = vmov 0.0  }
 0x149   : > { %v850_v17 = vsel %vm412_vm2, %v2346_v11, -inf  ;;  %1765 = vpow2.f32 %v797_v15  ;;  %410 = vst.msk [vmem:[#allocation2] sm:$0xf] %vm409_vm1, %v2072_v42 }
 0x14a   : > { %v913_v22 = vmul.f32 1.442695, %v912_v14  ;;  %v2356_v26 = vpop.eup %1761  ;;  %411 = vst.msk [vmem:[#allocation2 + $0x4] sm:$0xf] %vm409_vm1, %v2072_v42 }
 0x14b   : > { %v962_v16 = vpop.f32.mrf.mxu1  ;;  %v2360_v30 = vpop.eup %1763  ;;  %v566_v32 = vsel %vm412_vm2, %v2356_v26, 0.0  ;;  %413 = vst.msk [vmem:[#allocation3] sm:$0x3] %vm412_vm2, %v2072_v42 }
 0x14c   : > { %v2350_v18 = vmul.f32 0.25, %v962_v16  ;;  %851 = vmax.xlane.f32.xlu2 %v850_v17  ;;  %v1027_v19 = vpop.xlane.xlu2 %1026  ;;  %1767 = vpow2.f32 %v913_v22  ;;  %v683_v34 = vsel %vm409_vm1, %v2360_v30, 0.0  ;;  %414 = vst.msk [vmem:[#allocation3 + $0x2] sm:$0x3] %vm412_vm2, %v2072_v42 }
 0x14d   : > { %v1028_v20 = vsub.f32 %v1024_v47, %v1027_v19 }
 0x14e   : > { %v1078_v21 = vpop.f32.mrf.mxu3  ;;  %v966_v24 = vsel %vm409_vm1, %v2350_v18, -inf  ;;  %v1143_v25 = vpop.xlane.xlu0 %1142 }
 0x14f   : > { %v2352_v23 = vmul.f32 0.25, %v1078_v21  ;;  %967 = vmax.xlane.f32.xlu0 %v966_v24  ;;  %v1144_v27 = vsub.f32 %v1140_v50, %v1143_v25  ;;  %v1029_v29 = vmul.f32 1.442695, %v1028_v20  ;;  %v2364_v33 = vpop.eup %1765 }
 0x150   : > { %v799_v36 = vsel %vm412_vm2, %v2364_v33, 0.0  ;;  %v469_v20 = vld [vmem:[#allocation2] sm:$0xf] }
 0x151   : > { %v1082_v28 = vsel %vm412_vm2, %v2352_v23, -inf  ;;  %v1145_v31 = vmul.f32 1.442695, %v1144_v27  ;;  %1769 = vpow2.f32 %v1029_v29 }
 0x152   : > { %1083 = vmax.xlane.f32.xlu1 %v1082_v28  ;;  %v2368_v35 = vpop.eup %1767 }
 0x153   : > { %1771 = vpow2.f32 %v1145_v31  ;;  %v915_v38 = vsel %vm409_vm1, %v2368_v35, 0.0 }
 0x154   : > { %567 = vadd.xlane.f32.xlu2 %v566_v32 }
 0x157   : > { %684 = vadd.xlane.f32.xlu0 %v683_v34  ;;  %v2372_v37 = vpop.eup %1769 }
 0x158   : > { %v1031_v40 = vsel %vm412_vm2, %v2372_v37, 0.0  ;;  %v1194_v22 = vpop.f32.mrf.mxu1 }
 0x159   : > { %v2376_v39 = vpop.eup %1771  ;;  %v1310_v16 = vpop.f32.mrf.mxu3  ;;  %v2421_v31 = vmul.f32 0.25, %v1194_v22 }
 0x15a   : > { %800 = vadd.xlane.f32.xlu1 %v799_v36  ;;  %v1147_v41 = vsel %vm409_vm1, %v2376_v39, 0.0  ;;  %v2410_v24 = vmul.f32 0.25, %v1310_v16 }
 0x15c   : > { %916 = vadd.xlane.f32.xlu2 %v915_v38 }
 0x15f   : > { %1032 = vadd.xlane.f32.xlu0 %v1031_v40 }
 0x162   : > { %1148 = vadd.xlane.f32.xlu1 %v1147_v41 }
 0x1af   : > { %v504_v43 = vpop.xlane.xlu0 %503 }
 0x1b0   : > { %v505_v44 = vsub.f32 %v2329_v56, %v504_v43  ;;  %v1314_v43 = vsel %vm412_vm2, %v2410_v24, -inf }
 0x1b2   : > { %v506_v45 = vmul.f32 1.442695, %v505_v44 }
 0x1b4   : > { %1773 = vpow2.f32 %v506_v45 }
 0x1b7   : > { %v619_v46 = vpop.xlane.xlu0 %618  ;;  %v453_v47 = vpop.xlane.xlu2 %452 }
 0x1b8   : > { %v620_v48 = vsub.f32 %v2333_v60, %v619_v46  ;;  %1775 = vrcp.f32 %v453_v47  ;;  %v463_v61 = vand.u32 2147483647, %v453_v47  ;;  %v465_v63 = vand.u32 2147483648, %v453_v47 }
 0x1b9   : > { %vm459_vm4 = vweird.f32 %v453_v47 }
 0x1ba   : > { %v736_v49 = vpop.xlane.xlu1 %735  ;;  %v2388_v50 = vpop.eup %1773  ;;  %v621_v51 = vmul.f32 1.442695, %v620_v48  ;;  %vm464_vm6 = vcmp.eq.f32.partialorder %v463_v61, 8.507059e+37  ;;  %v1198_v48 = vsel %vm409_vm1, %v2421_v31, -inf }
 0x1bb   : > { %v737_v52 = vsub.f32 %v2337_v2, %v736_v49  ;;  %v508_v53 = vsel %vm409_vm1, %v2388_v50, 0.0 }
 0x1bc   : > { %1777 = vpow2.f32 %v621_v51  ;;  %509 = vadd.xlane.f32.xlu2 %v508_v53 }
 0x1bd   : > { %v738_v54 = vmul.f32 1.442695, %v737_v52 }
 0x1be   : > { %v1776_v55 = vpop.eup %1775 }
 0x1bf   : > { %1779 = vpow2.f32 %v738_v54  ;;  %v455_v56 = vmul.f32 %v1776_v55, %v453_v47  ;;  %v852_v57 = vpop.xlane.xlu2 %851  ;;  %vm460_vm3 = vweird.f32 %v1776_v55 }
 0x1c0   : > { %v853_v58 = vsub.f32 %v2346_v11, %v852_v57  ;;  %vm461_vm5 = vmor %vm459_vm4, %vm460_vm3  ;;  %v466_v11 = vor.u32 1.1754944e-38, %v465_v63 }
 0x1c1   : > { %v456_v59 = vsub.f32 1.0, %v455_v56 }
 0x1c2   : > { %v2394_v60 = vpop.eup %1777  ;;  %v854_v0 = vmul.f32 1.442695, %v853_v58  ;;  %v968_v1 = vpop.xlane.xlu0 %967 }
 0x1c3   : > { %v457_v2 = vmul.f32 %v1776_v55, %v456_v59  ;;  %v969_v3 = vsub.f32 %v2350_v18, %v968_v1  ;;  %v623_v4 = vsel %vm412_vm2, %v2394_v60, 0.0  ;;  %v1253_v18 = vpop.f32.mrf.mxu2 }
 0x1c4   : > { %1781 = vpow2.f32 %v854_v0  ;;  %624 = vadd.xlane.f32.xlu1 %v623_v4  ;;  %v2419_v29 = vmul.f32 0.25, %v1253_v18  ;;  %v584_v18 = vld [vmem:[#allocation3] sm:$0x3] }
 0x1c5   : > { %v2399_v5 = vpop.eup %1779  ;;  %v1084_v6 = vpop.xlane.xlu1 %1083  ;;  %v458_v7 = vadd.f32 %v1776_v55, %v457_v2  ;;  %v970_v8 = vmul.f32 1.442695, %v969_v3 }
 0x1c6   : > { %v1085_v9 = vsub.f32 %v2352_v23, %v1084_v6  ;;  %v740_v10 = vsel %vm409_vm1, %v2399_v5, 0.0  ;;  %v1257_v47 = vsel %vm412_vm2, %v2419_v29, -inf }
 0x1c7   : > { %741 = vadd.xlane.f32.xlu2 %v740_v10  ;;  %v462_v12 = vsel %vm461_vm5, %v1776_v55, %v458_v7  ;;  %1783 = vpow2.f32 %v970_v8  ;;  %v568_v14 = vpop.xlane.xlu2 %567 }
 0x1c8   : > { %v1086_v13 = vmul.f32 1.442695, %v1085_v9  ;;  %v467_v15 = vsel %vm464_vm6, %v466_v11, %v462_v12  ;;  %1785 = vrcp.f32 %v568_v14  ;;  %v578_v34 = vand.u32 2147483647, %v568_v14 }
 0x1c9   : > { %v468_v17 = vmul.f32 %v2335_v62, %v467_v15  ;;  %v580_v42 = vand.u32 2147483648, %v568_v14  ;;  %vm574_vm7 = vweird.f32 %v568_v14 }
 0x1ca   : > { %1787 = vpow2.f32 %v1086_v13  ;;  %v2405_v19 = vpop.eup %1781  ;;  %v2407_v21 = vpop.xlane.xlu0 %684  ;;  %vm2439_vm8 = vcmp.eq.f32.partialorder %v578_v34, 8.507059e+37 }
 0x1cb   : > { %v470_v23 = vmul.f32 0.25, %v468_v17  ;;  %1789 = vrcp.f32 %v2407_v21  ;;  %v856_v25 = vsel %vm412_vm2, %v2405_v19, 0.0  ;;  %v695_v52 = vand.u32 2147483647, %v2407_v21 }
 0x1cc   : > { %857 = vadd.xlane.f32.xlu0 %v856_v25  ;;  %v697_v56 = vand.u32 2147483648, %v2407_v21  ;;  %v581_v57 = vor.u32 1.1754944e-38, %v580_v42  ;;  %vm691_vm10 = vweird.f32 %v2407_v21 }
 0x1cd   : > { %v2414_v27 = vpop.xlane.xlu1 %800  ;;  %v2416_v28 = vpop.eup %1783  ;;  %v471_v62 = vadd.f32 %v470_v23, %v469_v20  ;;  %vm2458_vm14 = vcmp.eq.f32.partialorder %v695_v52, 8.507059e+37 }
 0x1ce   : > { %1791 = vrcp.f32 %v2414_v27  ;;  %v1786_v32 = vpop.eup %1785  ;;  %v972_v36 = vsel %vm409_vm1, %v2416_v28, 0.0  ;;  %vm807_vm11 = vweird.f32 %v2414_v27  ;;  %v813_v0 = vand.u32 2147483648, %v2414_v27 }
 0x1cf   : > { %472 = vst.msk [vmem:[#allocation2] sm:$0xf] %vm409_vm1, %v471_v62  ;;  %v570_v40 = vmul.f32 %v1786_v32, %v568_v14  ;;  %973 = vadd.xlane.f32.xlu1 %v972_v36  ;;  %v2428_v41 = vpop.xlane.xlu2 %916  ;;  %vm575_vm9 = vweird.f32 %v1786_v32  ;;  %v811_v4 = vand.u32 2147483647, %v2414_v27  ;;  %v698_v8 = vor.u32 1.1754944e-38, %v697_v56 }
 0x1d0   : > { %v2425_v38 = vpop.eup %1787  ;;  %1793 = vrcp.f32 %v2428_v41  ;;  %vm576_vm12 = vmor %vm574_vm7, %vm575_vm9  ;;  %v814_v15 = vor.u32 1.1754944e-38, %v813_v0  ;;  %v927_v17 = vand.u32 2147483647, %v2428_v41  ;;  %v929_v23 = vand.u32 2147483648, %v2428_v41 }
 0x1d1   : > { %v1790_v44 = vpop.eup %1789  ;;  %v571_v45 = vsub.f32 1.0, %v570_v40  ;;  %v1088_v46 = vsel %vm412_vm2, %v2425_v38, 0.0  ;;  %vm812_vm5 = vcmp.eq.f32.partialorder %v811_v4, 8.507059e+37  ;;  %vm923_vm6 = vweird.f32 %v2428_v41 }
 0x1d2   : > { %v687_v51 = vmul.f32 %v1790_v44, %v2407_v21  ;;  %v2445_v53 = vpop.xlane.xlu0 %1032  ;;  %1089 = vadd.xlane.f32.xlu2 %v1088_v46  ;;  %vm692_vm13 = vweird.f32 %v1790_v44 }
 0x1d3   : > { %v572_v55 = vmul.f32 %v1786_v32, %v571_v45  ;;  %1795 = vrcp.f32 %v2445_v53  ;;  %vm693_vm0 = vmor %vm691_vm10, %vm692_vm13  ;;  %v1045_v56 = vand.u32 2147483648, %v2445_v53  ;;  %vm1039_vm10 = vweird.f32 %v2445_v53 }
 0x1d4   : > { %v1792_v54 = vpop.eup %1791  ;;  %v688_v58 = vsub.f32 1.0, %v687_v51  ;;  %1258 = vmax.xlane.f32.xlu0 %v1257_v47 }
 0x1d5   : > { %v803_v59 = vmul.f32 %v1792_v54, %v2414_v27  ;;  %v2451_v61 = vpop.xlane.xlu1 %1148  ;;  %v573_v63 = vadd.f32 %v1786_v32, %v572_v55  ;;  %vm808_vm15 = vweird.f32 %v1792_v54 }
 0x1d6   : > { %1797 = vrcp.f32 %v2451_v61  ;;  %v1794_v1 = vpop.eup %1793  ;;  %v689_v2 = vmul.f32 %v1790_v44, %v688_v58  ;;  %vm809_vm3 = vmor %vm807_vm11, %vm808_vm15  ;;  %v1161_v0 = vand.u32 2147483648, %v2451_v61  ;;  %vm1155_vm13 = vweird.f32 %v2451_v61 }
 0x1d7   : > { %v804_v3 = vsub.f32 1.0, %v803_v59  ;;  %v577_v6 = vsel %vm576_vm12, %v1786_v32, %v573_v63  ;;  %v919_v9 = vmul.f32 %v1794_v1, %v2428_v41  ;;  %1315 = vmax.xlane.f32.xlu1 %v1314_v43  ;;  %vm924_vm4 = vweird.f32 %v1794_v1 }
 0x1d8   : > { %v582_v10 = vsel %vm2439_vm8, %v581_v57, %v577_v6  ;;  %v690_v11 = vadd.f32 %v1790_v44, %v689_v2  ;;  %vm925_vm7 = vmor %vm923_vm6, %vm924_vm4  ;;  %vm928_vm8 = vcmp.eq.f32.partialorder %v927_v17, 8.507059e+37  ;;  %v1043_v57 = vand.u32 2147483647, %v2445_v53 }
 0x1d9   : > { %v805_v12 = vmul.f32 %v1792_v54, %v804_v3  ;;  %v2465_v13 = vpop.eup %1795  ;;  %v583_v14 = vmul.f32 %v2356_v26, %v582_v10  ;;  %v920_v16 = vsub.f32 1.0, %v919_v9  ;;  %v1046_v2 = vor.u32 1.1754944e-38, %v1045_v56 }
 0x1da   : > { %v694_v20 = vsel %vm693_vm0, %v1790_v44, %v690_v11  ;;  %v1035_v25 = vmul.f32 %v2465_v13, %v2445_v53  ;;  %1199 = vmax.xlane.f32.xlu2 %v1198_v48  ;;  %v701_v48 = vld [vmem:[#allocation2] sm:$0xf]  ;;  %vm1040_vm9 = vweird.f32 %v2465_v13  ;;  %v1159_v3 = vand.u32 2147483647, %v2451_v61 }
 0x1db   : > { %v806_v22 = vadd.f32 %v1792_v54, %v805_v12  ;;  %v585_v32 = vmul.f32 0.25, %v583_v14  ;;  %v699_v26 = vsel %vm2458_vm14, %v698_v8, %v694_v20  ;;  %v921_v21 = vmul.f32 %v1794_v1, %v920_v16  ;;  %vm1041_vm11 = vmor %vm1039_vm10, %vm1040_vm9 }
 0x1dc   : > { %v1798_v62 = vpop.eup %1797  ;;  %v700_v34 = vmul.f32 %v2360_v30, %v699_v26  ;;  %v1036_v40 = vsub.f32 1.0, %v1035_v25  ;;  %v930_v30 = vor.u32 1.1754944e-38, %v929_v23  ;;  %vm1044_vm14 = vcmp.eq.f32.partialorder %v1043_v57, 8.507059e+37 }
 0x1dd   : > { %v810_v36 = vsel %vm809_vm3, %v1792_v54, %v806_v22  ;;  %v1151_v42 = vmul.f32 %v1798_v62, %v2451_v61  ;;  %v586_v43 = vadd.f32 %v585_v32, %v584_v18  ;;  %v922_v44 = vadd.f32 %v1794_v1, %v921_v21 }
 0x1de   : > { %v702_v45 = vmul.f32 0.25, %v700_v34  ;;  %v815_v46 = vsel %vm812_vm5, %v814_v15, %v810_v36  ;;  %v1037_v47 = vmul.f32 %v2465_v13, %v1036_v40  ;;  %vm1156_vm12 = vweird.f32 %v1798_v62 }
 0x1df   : > { %v1152_v27 = vsub.f32 1.0, %v1151_v42  ;;  %587 = vst.msk [vmem:[#allocation3] sm:$0x3] %vm412_vm2, %v586_v43  ;;  %v926_v49 = vsel %vm925_vm7, %v1794_v1, %v922_v44  ;;  %v816_v52 = vmul.f32 %v2364_v33, %v815_v46  ;;  %vm1157_vm15 = vmor %vm1155_vm13, %vm1156_vm12  ;;  %v1162_v8 = vor.u32 1.1754944e-38, %v1161_v0 }
 0x1e0   : > { %v703_v51 = vadd.f32 %v702_v45, %v701_v48  ;;  %v931_v54 = vsel %vm928_vm8, %v930_v30, %v926_v49  ;;  %v1038_v41 = vadd.f32 %v2465_v13, %v1037_v47  ;;  %vm1160_vm0 = vcmp.eq.f32.partialorder %v1159_v3, 8.507059e+37  ;;  %v527_v49 = vld [vmem:[#allocation2 + $0x4] sm:$0xf] }
 0x1e1   : > { %v1153_v55 = vmul.f32 %v1798_v62, %v1152_v27  ;;  %v932_v58 = vmul.f32 %v2368_v35, %v931_v54  ;;  %v818_v63 = vmul.f32 0.25, %v816_v52 }
 0x1e2   : > { %704 = vst.msk [vmem:[#allocation2] sm:$0xf] %vm409_vm1, %v703_v51  ;;  %v1042_v33 = vsel %vm1041_vm11, %v2465_v13, %v1038_v41 }
 0x1e3   : > { %v1154_v59 = vadd.f32 %v1798_v62, %v1153_v55  ;;  %v934_v53 = vmul.f32 0.25, %v932_v58  ;;  %v1047_v6 = vsel %vm1044_vm14, %v1046_v2, %v1042_v33 }
 0x1e4   : > { %v1048_v10 = vmul.f32 %v2372_v37, %v1047_v6 }
 0x1e5   : > { %v1158_v35 = vsel %vm1157_vm15, %v1798_v62, %v1154_v59 }
 0x1e6   : > { %v817_v1 = vld [vmem:[#allocation3] sm:$0x3]  ;;  %v1163_v11 = vsel %vm1160_vm0, %v1162_v8, %v1158_v35  ;;  %v1050_v12 = vmul.f32 0.25, %v1048_v10 }
 0x1e7   : > { %v819_v4 = vadd.f32 %v818_v63, %v817_v1  ;;  %v1164_v61 = vmul.f32 %v2376_v39, %v1163_v11 }
 0x1e9   : > { %820 = vst.msk [vmem:[#allocation3] sm:$0x3] %vm412_vm2, %v819_v4  ;;  %v933_v7 = vld [vmem:[#allocation2] sm:$0xf]  ;;  %v1166_v15 = vmul.f32 0.25, %v1164_v61 }
 0x1ea   : > { %v935_v9 = vadd.f32 %v934_v53, %v933_v7 }
 0x1ec   : > { %936 = vst.msk [vmem:[#allocation2] sm:$0xf] %vm409_vm1, %v935_v9 }
 0x1f0   : > { %v1049_v13 = vld [vmem:[#allocation3] sm:$0x3] }
 0x1f1   : > { %v1051_v14 = vadd.f32 %v1050_v12, %v1049_v13  ;;  %v642_v12 = vld [vmem:[#allocation3 + $0x2] sm:$0x3] }
 0x1f3   : > { %1052 = vst.msk [vmem:[#allocation3] sm:$0x3] %vm412_vm2, %v1051_v14  ;;  %v1165_v16 = vld [vmem:[#allocation2] sm:$0xf] }
 0x1f4   : > { %v1167_v17 = vadd.f32 %v1166_v15, %v1165_v16 }
 0x1f6   : > { %1168 = vst.msk [vmem:[#allocation2] sm:$0xf] %vm409_vm1, %v1167_v17 }
 0x1fd   : > { %v1342_v18 = vld [vmem:[#allocation2] sm:$0xf] }
 0x1fe   : > { %1344 = vst.msk [vmem:[%s2503_s30] sm:$0xf] %vm409_vm1, %v1342_v18 }
 0x22f   : > { %v510_v37 = vpop.xlane.xlu2 %509 }
 0x230   : > { %1799 = vrcp.f32 %v510_v37  ;;  %v522_v62 = vand.u32 2147483648, %v510_v37  ;;  %v520_v26 = vand.u32 2147483647, %v510_v37  ;;  %vm516_vm4 = vweird.f32 %v510_v37 }
 0x232   : > { %v523_v36 = vor.u32 1.1754944e-38, %v522_v62  ;;  %vm521_vm6 = vcmp.eq.f32.partialorder %v520_v26, 8.507059e+37 }
 0x236   : > { %v1800_v20 = vpop.eup %1799 }
 0x237   : > { %v512_v39 = vmul.f32 %v1800_v20, %v510_v37  ;;  %v625_v22 = vpop.xlane.xlu1 %624  ;;  %vm517_vm3 = vweird.f32 %v1800_v20 }
 0x238   : > { %1801 = vrcp.f32 %v625_v22  ;;  %vm518_vm5 = vmor %vm516_vm4, %vm517_vm3  ;;  %v635_v27 = vand.u32 2147483647, %v625_v22  ;;  %v637_v30 = vand.u32 2147483648, %v625_v22  ;;  %vm631_vm8 = vweird.f32 %v625_v22 }
 0x239   : > { %v513_v23 = vsub.f32 1.0, %v512_v39 }
 0x23a   : > { %v742_v25 = vpop.xlane.xlu2 %741  ;;  %vm636_vm11 = vcmp.eq.f32.partialorder %v635_v27, 8.507059e+37  ;;  %v638_v0 = vor.u32 1.1754944e-38, %v637_v30 }
 0x23b   : > { %1803 = vrcp.f32 %v742_v25  ;;  %v514_v32 = vmul.f32 %v1800_v20, %v513_v23  ;;  %v752_v51 = vand.u32 2147483647, %v742_v25  ;;  %v754_v56 = vand.u32 2147483648, %v742_v25 }
 0x23c   : > { %vm748_vm12 = vweird.f32 %v742_v25 }
 0x23d   : > { %v515_v21 = vadd.f32 %v1800_v20, %v514_v32  ;;  %vm753_vm13 = vcmp.eq.f32.partialorder %v752_v51, 8.507059e+37  ;;  %v755_v6 = vor.u32 1.1754944e-38, %v754_v56 }
 0x23e   : > { %v1802_v34 = vpop.eup %1801 }
 0x23f   : > { %v519_v40 = vsel %vm518_vm5, %v1800_v20, %v515_v21  ;;  %v627_v42 = vmul.f32 %v1802_v34, %v625_v22  ;;  %v2507_v45 = vpop.xlane.xlu0 %857  ;;  %vm632_vm7 = vweird.f32 %v1802_v34 }
 0x240   : > { %v524_v44 = vsel %vm521_vm6, %v523_v36, %v519_v40  ;;  %1805 = vrcp.f32 %v2507_v45  ;;  %v868_v63 = vand.u32 2147483647, %v2507_v45  ;;  %vm633_vm10 = vmor %vm631_vm8, %vm632_vm7  ;;  %vm864_vm15 = vweird.f32 %v2507_v45 }
 0x241   : > { %v1804_v43 = vpop.eup %1803  ;;  %v525_v46 = vmul.f32 %v2388_v50, %v524_v44  ;;  %v628_v47 = vsub.f32 1.0, %v627_v42  ;;  %v870_v50 = vand.u32 2147483648, %v2507_v45 }
 0x242   : > { %v744_v48 = vmul.f32 %v1804_v43, %v742_v25  ;;  %v2511_v52 = vpop.xlane.xlu1 %973  ;;  %vm749_vm9 = vweird.f32 %v1804_v43  ;;  %vm2526_vm0 = vcmp.eq.f32.partialorder %v868_v63, 8.507059e+37 }
 0x243   : > { %v528_v54 = vmul.f32 0.25, %v525_v46  ;;  %v629_v41 = vmul.f32 %v1802_v34, %v628_v47  ;;  %1807 = vrcp.f32 %v2511_v52  ;;  %v984_v1 = vand.u32 2147483647, %v2511_v52  ;;  %vm750_vm14 = vmor %vm748_vm12, %vm749_vm9 }
 0x244   : > { %v745_v55 = vsub.f32 1.0, %v744_v48  ;;  %v871_v35 = vor.u32 1.1754944e-38, %v870_v50  ;;  %vm980_vm3 = vweird.f32 %v2511_v52  ;;  %v986_v16 = vand.u32 2147483648, %v2511_v52 }
 0x245   : > { %v529_v57 = vadd.f32 %v528_v54, %v527_v49  ;;  %v630_v58 = vadd.f32 %v1802_v34, %v629_v41  ;;  %v2516_v33 = vpop.xlane.xlu2 %1089  ;;  %vm2532_vm4 = vcmp.eq.f32.partialorder %v984_v1, 8.507059e+37 }
 0x246   : > { %v746_v59 = vmul.f32 %v1804_v43, %v745_v55  ;;  %1809 = vrcp.f32 %v2516_v33  ;;  %v1806_v4 = vpop.eup %1805  ;;  %vm1096_vm6 = vweird.f32 %v2516_v33  ;;  %v987_v46 = vor.u32 1.1754944e-38, %v986_v16 }
 0x247   : > { %530 = vst.msk [vmem:[#allocation2 + $0x4] sm:$0xf] %vm409_vm1, %v529_v57  ;;  %v634_v2 = vsel %vm633_vm10, %v1802_v34, %v630_v58  ;;  %v1259_v7 = vpop.xlane.xlu0 %1258  ;;  %v860_v11 = vmul.f32 %v1806_v4, %v2507_v45  ;;  %vm865_vm5 = vweird.f32 %v1806_v4  ;;  %v1100_v45 = vand.u32 2147483647, %v2516_v33 }
 0x248   : > { %v747_v3 = vadd.f32 %v1804_v43, %v746_v59  ;;  %v639_v53 = vsel %vm636_vm11, %v638_v0, %v634_v2  ;;  %v1260_v20 = vsub.f32 %v2419_v29, %v1259_v7  ;;  %vm866_vm8 = vmor %vm864_vm15, %vm865_vm5  ;;  %v1102_v30 = vand.u32 2147483648, %v2516_v33 }
 0x249   : > { %v1808_v8 = vpop.eup %1807  ;;  %v640_v9 = vmul.f32 %v2394_v60, %v639_v53  ;;  %v861_v37 = vsub.f32 1.0, %v860_v11  ;;  %vm1101_vm12 = vcmp.eq.f32.partialorder %v1100_v45, 8.507059e+37 }
 0x24a   : > { %v751_v10 = vsel %vm750_vm14, %v1804_v43, %v747_v3  ;;  %v976_v14 = vmul.f32 %v1808_v8, %v2511_v52  ;;  %v1316_v60 = vpop.xlane.xlu1 %1315  ;;  %vm981_vm7 = vweird.f32 %v1808_v8  ;;  %v1103_v58 = vor.u32 1.1754944e-38, %v1102_v30 }
 0x24b   : > { %v756_v13 = vsel %vm753_vm13, %v755_v6, %v751_v10  ;;  %v643_v17 = vmul.f32 0.25, %v640_v9  ;;  %v1317_v23 = vsub.f32 %v2410_v24, %v1316_v60  ;;  %v862_v32 = vmul.f32 %v1806_v4, %v861_v37  ;;  %vm982_vm10 = vmor %vm980_vm3, %vm981_vm7 }
 0x24c   : > { %v757_v18 = vmul.f32 %v2399_v5, %v756_v13  ;;  %v1810_v39 = vpop.eup %1809  ;;  %v977_v22 = vsub.f32 1.0, %v976_v14  ;;  %v1261_v5 = vmul.f32 1.442695, %v1260_v20 }
 0x24d   : > { %v644_v25 = vadd.f32 %v643_v17, %v642_v12  ;;  %v1092_v26 = vmul.f32 %v1810_v39, %v2516_v33  ;;  %v1200_v21 = vpop.xlane.xlu2 %1199  ;;  %v1318_v40 = vmul.f32 1.442695, %v1317_v23  ;;  %v863_v42 = vadd.f32 %v1806_v4, %v862_v32 }
 0x24e   : > { %v759_v62 = vmul.f32 0.25, %v757_v18  ;;  %v758_v34 = vld [vmem:[#allocation2 + $0x4] sm:$0xf]  ;;  %v978_v36 = vmul.f32 %v1808_v8, %v977_v22  ;;  %v1201_v44 = vsub.f32 %v2421_v31, %v1200_v21  ;;  %vm1097_vm9 = vweird.f32 %v1810_v39 }
 0x24f   : > { %645 = vst.msk [vmem:[#allocation3 + $0x2] sm:$0x3] %vm412_vm2, %v644_v25  ;;  %v1093_v43 = vsub.f32 1.0, %v1092_v26  ;;  %1811 = vpow2.f32 %v1261_v5  ;;  %v867_v47 = vsel %vm866_vm8, %v1806_v4, %v863_v42  ;;  %vm1098_vm11 = vmor %vm1096_vm6, %vm1097_vm9 }
 0x250   : > { %v760_v29 = vadd.f32 %v759_v62, %v758_v34  ;;  %v979_v24 = vadd.f32 %v1808_v8, %v978_v36  ;;  %1813 = vpow2.f32 %v1318_v40  ;;  %v1202_v48 = vmul.f32 1.442695, %v1201_v44 }
 0x251   : > { %v1094_v27 = vmul.f32 %v1810_v39, %v1093_v43  ;;  %v872_v31 = vsel %vm2526_vm0, %v871_v35, %v867_v47 }
 0x252   : > { %761 = vst.msk [vmem:[#allocation2 + $0x4] sm:$0xf] %vm409_vm1, %v760_v29  ;;  %v983_v49 = vsel %vm982_vm10, %v1808_v8, %v979_v24  ;;  %v873_v51 = vmul.f32 %v2405_v19, %v872_v31  ;;  %1815 = vpow2.f32 %v1202_v48  ;;  %v1281_v48 = vld [vmem:[#allocation3] sm:$0x3] }
 0x253   : > { %v988_v54 = vsel %vm2532_vm4, %v987_v46, %v983_v49  ;;  %v1095_v41 = vadd.f32 %v1810_v39, %v1094_v27 }
 0x254   : > { %v989_v52 = vmul.f32 %v2416_v28, %v988_v54  ;;  %v875_v55 = vmul.f32 0.25, %v873_v51 }
 0x255   : > { %v1099_v56 = vsel %vm1098_vm11, %v1810_v39, %v1095_v41  ;;  %v2562_v50 = vpop.eup %1811 }
 0x256   : > { %v874_v57 = vld [vmem:[#allocation3 + $0x2] sm:$0x3]  ;;  %v2564_v59 = vpop.eup %1813  ;;  %v991_v63 = vmul.f32 0.25, %v989_v52  ;;  %v1263_v0 = vsel %vm412_vm2, %v2562_v50, 0.0  ;;  %v1104_v28 = vsel %vm1101_vm12, %v1103_v58, %v1099_v56 }
 0x257   : > { %v876_v19 = vadd.f32 %v875_v55, %v874_v57  ;;  %1264 = vadd.xlane.f32.xlu0 %v1263_v0  ;;  %v1320_v33 = vsel %vm412_vm2, %v2564_v59, 0.0  ;;  %v1105_v53 = vmul.f32 %v2425_v38, %v1104_v28 }
 0x258   : > { %v2570_v2 = vpop.eup %1815  ;;  %1321 = vadd.xlane.f32.xlu1 %v1320_v33 }
 0x259   : > { %v990_v1 = vld [vmem:[#allocation2 + $0x4] sm:$0xf]  ;;  %877 = vst.msk [vmem:[#allocation3 + $0x2] sm:$0x3] %vm412_vm2, %v876_v19  ;;  %v1204_v4 = vsel %vm409_vm1, %v2570_v2, 0.0  ;;  %v1107_v6 = vmul.f32 0.25, %v1105_v53 }
 0x25a   : > { %v992_v3 = vadd.f32 %v991_v63, %v990_v1  ;;  %1205 = vadd.xlane.f32.xlu2 %v1204_v4 }
 0x25c   : > { %993 = vst.msk [vmem:[#allocation2 + $0x4] sm:$0xf] %vm409_vm1, %v992_v3 }
 0x260   : > { %v1106_v35 = vld [vmem:[#allocation3 + $0x2] sm:$0x3] }
 0x261   : > { %v1108_v7 = vadd.f32 %v1107_v6, %v1106_v35 }
 0x263   : > { %1109 = vst.msk [vmem:[#allocation3 + $0x2] sm:$0x3] %vm412_vm2, %v1108_v7  ;;  %v1222_v41 = vld [vmem:[#allocation2 + $0x4] sm:$0xf] }
 0x26a   : > { %v1338_v30 = vld [vmem:[#allocation3 + $0x2] sm:$0x3] }
 0x2ca   : > { %v1265_v8 = vpop.xlane.xlu0 %1264 }
 0x2cb   : > { %1817 = vrcp.f32 %v1265_v8  ;;  %v1322_v9 = vpop.xlane.xlu1 %1321  ;;  %v1277_v16 = vand.u32 2147483648, %v1265_v8  ;;  %v1275_v38 = vand.u32 2147483647, %v1265_v8  ;;  %vm1271_vm14 = vweird.f32 %v1265_v8 }
 0x2cc   : > { %1819 = vrcp.f32 %v1322_v9  ;;  %v1332_v37 = vand.u32 2147483647, %v1322_v9  ;;  %v1334_v20 = vand.u32 2147483648, %v1322_v9  ;;  %vm1328_vm0 = vweird.f32 %v1322_v9 }
 0x2cd   : > { %v1206_v10 = vpop.xlane.xlu2 %1205  ;;  %v1278_v25 = vor.u32 1.1754944e-38, %v1277_v16  ;;  %vm1276_vm5 = vcmp.eq.f32.partialorder %v1275_v38, 8.507059e+37 }
 0x2ce   : > { %1821 = vrcp.f32 %v1206_v10  ;;  %v1218_v62 = vand.u32 2147483648, %v1206_v10  ;;  %v1216_v21 = vand.u32 2147483647, %v1206_v10  ;;  %vm1333_vm7 = vcmp.eq.f32.partialorder %v1332_v37, 8.507059e+37 }
 0x2cf   : > { %v1335_v36 = vor.u32 1.1754944e-38, %v1334_v20  ;;  %vm1212_vm8 = vweird.f32 %v1206_v10 }
 0x2d0   : > { %v1219_v44 = vor.u32 1.1754944e-38, %v1218_v62  ;;  %vm1217_vm10 = vcmp.eq.f32.partialorder %v1216_v21, 8.507059e+37 }
 0x2d1   : > { %v1818_v11 = vpop.eup %1817 }
 0x2d2   : > { %v1820_v61 = vpop.eup %1819  ;;  %v1267_v12 = vmul.f32 %v1818_v11, %v1265_v8  ;;  %vm1272_vm13 = vweird.f32 %v1818_v11 }
 0x2d3   : > { %v1324_v13 = vmul.f32 %v1820_v61, %v1322_v9  ;;  %vm1329_vm15 = vweird.f32 %v1820_v61  ;;  %vm1273_vm3 = vmor %vm1271_vm14, %vm1272_vm13 }
 0x2d4   : > { %v1822_v14 = vpop.eup %1821  ;;  %v1268_v15 = vsub.f32 1.0, %v1267_v12  ;;  %vm1330_vm6 = vmor %vm1328_vm0, %vm1329_vm15 }
 0x2d5   : > { %v1325_v60 = vsub.f32 1.0, %v1324_v13  ;;  %v1208_v17 = vmul.f32 %v1822_v14, %v1206_v10  ;;  %vm1213_vm4 = vweird.f32 %v1822_v14 }
 0x2d6   : > { %v1269_v18 = vmul.f32 %v1818_v11, %v1268_v15  ;;  %vm1214_vm9 = vmor %vm1212_vm8, %vm1213_vm4 }
 0x2d7   : > { %v1326_v39 = vmul.f32 %v1820_v61, %v1325_v60  ;;  %v1209_v22 = vsub.f32 1.0, %v1208_v17 }
 0x2d8   : > { %v1270_v23 = vadd.f32 %v1818_v11, %v1269_v18 }
 0x2d9   : > { %v1327_v32 = vadd.f32 %v1820_v61, %v1326_v39  ;;  %v1210_v26 = vmul.f32 %v1822_v14, %v1209_v22 }
 0x2da   : > { %v1274_v34 = vsel %vm1273_vm3, %v1818_v11, %v1270_v23 }
 0x2db   : > { %v1279_v5 = vsel %vm1276_vm5, %v1278_v25, %v1274_v34  ;;  %v1331_v40 = vsel %vm1330_vm6, %v1820_v61, %v1327_v32  ;;  %v1211_v29 = vadd.f32 %v1822_v14, %v1210_v26 }
 0x2dc   : > { %v1280_v42 = vmul.f32 %v2562_v50, %v1279_v5  ;;  %v1336_v43 = vsel %vm1333_vm7, %v1335_v36, %v1331_v40 }
 0x2dd   : > { %v1337_v24 = vmul.f32 %v2564_v59, %v1336_v43  ;;  %v1215_v46 = vsel %vm1214_vm9, %v1822_v14, %v1211_v29 }
 0x2de   : > { %v1282_v47 = vmul.f32 0.25, %v1280_v42  ;;  %v1220_v27 = vsel %vm1217_vm10, %v1219_v44, %v1215_v46 }
 0x2df   : > { %v1339_v31 = vmul.f32 0.25, %v1337_v24  ;;  %v1221_v49 = vmul.f32 %v2570_v2, %v1220_v27 }
 0x2e0   : > { %v1283_v45 = vadd.f32 %v1282_v47, %v1281_v48 }
 0x2e1   : > { %v1340_v51 = vadd.f32 %v1339_v31, %v1338_v30  ;;  %v1223_v54 = vmul.f32 0.25, %v1221_v49 }
 0x2e2   : > { %1284 = vst.msk [vmem:[#allocation3] sm:$0x3] %vm412_vm2, %v1283_v45 }
 0x2e3   : > { %1341 = vst.msk [vmem:[#allocation3 + $0x2] sm:$0x3] %vm412_vm2, %v1340_v51  ;;  %v1224_v52 = vadd.f32 %v1223_v54, %v1222_v41 }
 0x2e5   : > { %1225 = vst.msk [vmem:[#allocation2 + $0x4] sm:$0xf] %vm409_vm1, %v1224_v52 }
 0x2e9   : > { %v1346_v55 = vld [vmem:[#allocation3] sm:$0x3] }
 0x2ea   : > { %v1347_v56 = vld [vmem:[#allocation3 + $0x2] sm:$0x3]  ;;  %1348 = vst.msk [vmem:[%s406_s23] sm:$0x3] %vm412_vm2, %v1346_v55 }
 0x2eb   : > { %1349 = vst.msk [vmem:[%s406_s23 + $0x2] sm:$0x3] %vm412_vm2, %v1347_v56 }
 0x2ec   : > { %v1343_v50 = vld [vmem:[#allocation2 + $0x4] sm:$0xf] }
 0x2ed   : > { %1970 = shalt.err (!%p1967_p13)
}
 0x2ee   : > { %s2073_s11 = smov 32   ;;  %s2074_s16 = smov 2   ;;  %1345 = vst.msk [vmem:[%s2503_s30 + $0x4] sm:$0xf] %vm409_vm1, %v1343_v50 }
 0x2ef   : > { %1676 = dma.vmem_to_hbm [thread:$0]  (%p2162_p9), %s1390_s21, 64, %s1392_s0, %s1356_s9, %s2073_s11, %s2073_s11, %s2074_s16  }
 0x2f0   : > { %s1351_s10 = scalar_lea.sflag [#allocation6], %s2224_s18  ;;  %s1985_s7 = sshra.s32 %s2596_s29, 4  ;;  %s1986_s7 = int_to_ptr.hbm [resolvable:$true] %s1985_s7 }
 0x2f1   : > { %s1987_s25 = scalar_lea.hbm %s1986_s7, 8  ;;  %s1991_s26 = scalar_lea.hbm %s2654_s4, 16 }
 0x2f2   : > { %p1988_p0 = scmp.ne.s32.totalorder %s1986_s7, %s1987_s25  ;;  %p1992_p3 = scmp.lt.s32.totalorder %s1986_s7, %s2654_s4 }
 0x2f3   : > { %p1993_p4 = scmp.lt.s32.totalorder %s1991_s26, %s1987_s25 }
 0x2f4   : > { %p1989_p1 = pnand %p1988_p0, %p2162_p9 }
 0x2f5   : > { %p1994_p5 = por %p1993_p4, %p1992_p3 }
 0x2f6   : > { %p1990_p2 = pneg %p1989_p1 }
 0x2f8   : > { %p1995_p6 = pnand %p1994_p5, %p1990_p2 }
 0x2fa   : > { %1998 = shalt.err (!%p1995_p6)
}
 0x2fb   : > { %s2075_s18 = smov 64   ;;  %s2076_s30 = smov 4  }
 0x2fc   : > { %1675 = dma.vmem_to_hbm [thread:$0]  (%p2162_p9), %s2594_s8, 128, %s2596_s29, %s1351_s10, %s2075_s18, %s2075_s18, %s2076_s30  }
 0x2fd PF: > { %s2686_s21 = sld [smem:[#allocation20_spill]]  ;;  %p1693_p7 = pnand %p1589_p12, %p2169_p11 }
 0x2fe   : > { %s2688_s9 = sld [smem:[#allocation22_spill]] }
 0x2ff   : > { %p1694_p8 = pneg %p1693_p7 }
 0x303   : > { %s1406_s12 = sand.u32 1, %s2686_s21  }
 0x304   : > { %s1407_s14 = scalar_lea.sflag [#allocation6], %s1406_s12 }
 0x305   : > { %2036 = dma.done.wait (%p1694_p8), %s1407_s14, 128  }
 0x306   : > { %2038 = vsyncadd (%p1694_p8), %s1407_s14, 4294967168  ;;  %s1417_s13 = scalar_lea.sflag [#allocation14], %s1406_s12 }
 0x307   : > { %2040 = dma.done.wait (%p1694_p8), %s1417_s13, 64  }
 0x308   : > { %2042 = vsyncadd (%p1694_p8), %s1417_s13, 4294967232  ;;  %s31_s23 = sadd.s32 1, %s2688_s9   ;;  %s2689_s6 = sld [smem:[#allocation21_spill]] }
 0x309   : > { %p28_p10 = scmp.ge.s32.totalorder %s31_s23, 4   ;;  %s2690_s20 = sld [smem:[#allocation24_spill]] }
 0x30a   : > { %s2691_s8 = sld [smem:[#allocation23_spill]]  ;;  %s2692_s18 = smov %s2049_s19 }
 0x30b   : > { %s2694_s21 = smov %s2061_s22 }
 0x30c   :  { %30 = sbr.rel (!%p28_p10) target bundleno = 15 (0xf), region = 149 }
 0x30e   : > { %s2693_s19 = smov %s2689_s6 }
 0x310   : > { %s2695_s22 = smov %s2691_s8 }
 0x311   :  { %1423 = vsyncpa [#allocation5], 1 }
 0x312   :  { %1425 = vsyncpa [#allocation5 + $0x1], 1 }
 0x313   :  { %1426 = vsyncpa [#allocation8], 1 }
 0x314   :  { %1428 = vsyncpa [#allocation8 + $0x1], 1 }
 0x315   :  { %1429 = vsyncpa [#allocation11], 1 }
 0x316   :  { %1431 = vsyncpa [#allocation11 + $0x1], 1 }
 0x317   :  { %1432 = vsyncpa [#allocation6], 1 }
 0x318   :  { %1434 = vsyncpa [#allocation6 + $0x1], 1 }
 0x319   :  { %1435 = vsyncpa [#allocation14], 1 }
 0x31a   :  { %1437 = vsyncpa [#allocation14 + $0x1], 1 }

</bundles_post_ra>
